<compile_context>
chip_gen: v7x
topology: tpu7x:2x2x1
jax: 0.10.0
libtpu: 0.0.40
codegen_flags: <defaults>
</compile_context>

<pallas_src>
import functools
import math

import jax
import jax.numpy as jnp
from jax.experimental import pallas as pl
from jax.experimental.pallas import tpu as pltpu


# ----------------------------------------------------------------------------
# Kernel
# ----------------------------------------------------------------------------
def _swiglu_ffn_kernel(x_ref, w12_ref, b12_ref, w3_ref, b3_ref, o_ref, acc_ref,
                       *, th):
    # x_ref:   [tm, dim]    bf16 (matmul operand)
    # w12_ref: [dim, 2*th]  bf16 (cols [:th] = W1 hidden-tile, [th:] = W2 tile)
    # b12_ref: [1, 2*th]    f32
    # w3_ref:  [th, dim]    bf16
    # b3_ref:  [1, dim]     f32
    # o_ref:   [tm, dim]    output dtype
    # acc_ref: [tm, dim]    f32 accumulator, persists across hidden tiles
    j = pl.program_id(1)

    @pl.when(j == 0)
    def _init():
        acc_ref[...] = jnp.zeros_like(acc_ref)

    # fc1 and fc2 fused into one MXU matmul; f32 accumulation.
    h12 = jnp.dot(x_ref[...], w12_ref[...],
                  preferred_element_type=jnp.float32) + b12_ref[...]
    h1 = h12[:, :th]
    h2 = h12[:, th:]

    # SiLU(h1) * h2 in f32 (VPU / EUP).
    gated = (h1 * jax.nn.sigmoid(h1)) * h2

    # Partial fc3 for this hidden tile, accumulated in f32.
    acc_ref[...] += jnp.dot(gated.astype(w3_ref.dtype), w3_ref[...],
                            preferred_element_type=jnp.float32)

    @pl.when(j == pl.num_programs(1) - 1)
    def _finalize():
        o_ref[...] = (acc_ref[...] + b3_ref[...]).astype(o_ref.dtype)


# ----------------------------------------------------------------------------
# Hardware query / tile planning
# ----------------------------------------------------------------------------
def _round_up(x, m):
    return (x + m - 1) // m * m


def _vmem_capacity_bytes():
    """Physical VMEM per TensorCore; falls back to 128 MiB (v5e/v6e)."""
    try:
        info = pltpu.get_tpu_info()
        for attr in ("vmem_capacity_bytes", "vmem_size_bytes", "vmem_bytes"):
            v = getattr(info, attr, None)
            if v:
                return int(v)
    except Exception:
        pass
    return 128 * 2**20


def _pick_hidden_tile(hidden, want, align=128):
    """Divisor of `hidden` that is a multiple of `align`, preferring the
    largest one <= `want`; otherwise the smallest one > `want` (avoids the
    full-hidden fallback that would blow up VMEM for large models)."""
    if hidden <= want:
        return hidden
    best = None
    d = align
    while d <= want:
        if hidden % d == 0:
            best = d
        d += align
    if best is not None:
        return best
    d = _round_up(want + 1, align)
    while d < hidden:
        if hidden % d == 0:
            return d
        d += align
    return hidden


def plan_hidden_tile(hidden, vmem_cap=None):
    vmem_cap = vmem_cap or _vmem_capacity_bytes()
    th_target = 256 if vmem_cap <= 80 * 2**20 else 512   # v7x vs v5e/v6e
    return _pick_hidden_tile(hidden, th_target)


def _vmem_need_bytes(tm, th, dim, wb, out_b):
    x_t = tm * dim * wb
    w12_t = dim * 2 * th * wb
    b12_t = 2 * th * 4
    w3_t = th * dim * wb
    b3_t = dim * 4
    o_t = tm * dim * out_b
    dbuf = 2 * (x_t + w12_t + b12_t + w3_t + b3_t + o_t)   # double-buffered tiles
    acc = tm * dim * 4                                     # f32 accumulator
    temps = tm * 2 * th * 4 + tm * th * 4 + tm * th * wb   # h12, gated f32/bf16
    return dbuf + acc + temps


def _plan_token_tile(T, dim, th, wb, out_b, vmem_budget, vmem_cap):
    tm_target = 512 if vmem_cap <= 80 * 2**20 else 768     # v7x vs v5e/v6e
    align_m = 256 if T >= 512 else (128 if T >= 128 else 8)
    tm = min(tm_target, _round_up(T, align_m))
    tm = max(align_m, (tm // align_m) * align_m)
    T_pad = _round_up(T, tm)
    # Guarantee >=2 token tiles so both v7x TensorCores are fed.
    if T_pad // tm < 2 and tm >= 2 * align_m:
        tm = _round_up(tm // 2, align_m)
        T_pad = _round_up(T, tm)
    # Shrink tm until the double-buffered tile plan fits the VMEM budget.
    while tm > align_m and _vmem_need_bytes(tm, th, dim, wb, out_b) > vmem_budget:
        tm -= align_m
        T_pad = _round_up(T, tm)
    return tm, T_pad


# ----------------------------------------------------------------------------
# One-time weight prep (do at model load; cache and reuse every call)
# ----------------------------------------------------------------------------
def prepare_ffn_weights(w1, b1, w2, b2, w3, b3, *, th=None,
                        compute_dtype=jnp.bfloat16):
    """Weights are [in, out] (pre-transposed vs PyTorch's [out, in]).
    Produces a per-hidden-tile contiguous W1||W2 slab [nh, dim, 2*th]."""
    dim, hidden = w1.shape
    if th is None:
        th = plan_hidden_tile(hidden)
    nh = hidden // th

    w1t = w1.astype(compute_dtype).reshape(dim, nh, th)
    w2t = w2.astype(compute_dtype).reshape(dim, nh, th)
    w12 = jnp.concatenate([w1t, w2t], axis=2).transpose(1, 0, 2)   # [nh, dim, 2*th]
    b12 = jnp.concatenate([b1.astype(jnp.float32).reshape(nh, 1, th),
                           b2.astype(jnp.float32).reshape(nh, 1, th)],
                          axis=2)                                    # [nh, 1, 2*th]
    w3c = w3.astype(compute_dtype)                                   # [hidden, dim]
    b3c = b3.astype(jnp.float32).reshape(1, dim)
    return dict(w12=w12, b12=b12, w3=w3c, b3=b3c,
                dim=dim, hidden=hidden, th=th, nh=nh,
                compute_dtype=compute_dtype)


# ----------------------------------------------------------------------------
# Forward call
# ----------------------------------------------------------------------------
def feed_forward_pallas(x, prep, *, out_dtype=None, tm=None):
    """x: [..., dim]. prep: output of prepare_ffn_weights() (weights already
    fused / cast — no per-call weight shuffling)."""
    dim, hidden = prep["dim"], prep["hidden"]
    th, nh = prep["th"], prep["nh"]
    compute_dtype = prep["compute_dtype"]
    out_dtype = out_dtype or x.dtype

    orig_shape = x.shape
    x2d = x.reshape(-1, dim)
    T = x2d.shape[0]

    wb = jnp.dtype(compute_dtype).itemsize
    out_b = jnp.dtype(out_dtype).itemsize

    vmem_cap = _vmem_capacity_bytes()
    vmem_budget = int(0.85 * vmem_cap)    # headroom for compiler-internal scratch

    if tm is None:
        tm, T_pad = _plan_token_tile(T, dim, th, wb, out_b, vmem_budget, vmem_cap)
    else:
        tm = min(tm, _round_up(T, 8))
        T_pad = _round_up(T, tm)

    if T_pad != T:
        x2d = jnp.pad(x2d, ((0, T_pad - T), (0, 0)))
    x2d = x2d.astype(compute_dtype)

    n_tok_tiles = T_pad // tm
    weight_bytes = (prep["w12"].size + prep["w3"].size) * wb \
                   + (prep["b12"].size + prep["b3"].size) * 4
    cost = pl.CostEstimate(
        flops=6 * T_pad * dim * hidden,
        transcendentals=T_pad * hidden,
        # Weights are re-streamed once per token tile.
        bytes_accessed=int(x2d.size * wb + n_tok_tiles * weight_bytes
                           + T_pad * dim * out_b))

    kernel = functools.partial(_swiglu_ffn_kernel, th=th)

    out2d = pl.pallas_call(
        kernel,
        out_shape=jax.ShapeDtypeStruct((T_pad, dim), out_dtype),
        grid_spec=pltpu.PrefetchScalarGridSpec(
            num_scalar_prefetch=0,
            grid=(n_tok_tiles, nh),                       # (tokens, hidden-reduction)
            in_specs=[
                pl.BlockSpec((tm, dim), lambda i, j: (i, 0)),                        # x
                pl.BlockSpec((pl.Squeezed(), dim, 2 * th), lambda i, j: (j, 0, 0)),  # W1||W2 slab
                pl.BlockSpec((pl.Squeezed(), 1, 2 * th), lambda i, j: (j, 0, 0)),    # b1||b2
                pl.BlockSpec((th, dim), lambda i, j: (j, 0)),                        # W3 (contiguous rows)
                pl.BlockSpec((1, dim), lambda i, j: (0, 0)),                         # b3
            ],
            out_specs=pl.BlockSpec((tm, dim), lambda i, j: (i, 0)),
            scratch_shapes=[pltpu.VMEM((tm, dim), jnp.float32)],
        ),
        compiler_params=pltpu.CompilerParams(
            dimension_semantics=("parallel", "arbitrary"),
            vmem_limit_bytes=vmem_budget),
        cost_estimate=cost,
    )(x2d, prep["w12"], prep["b12"], prep["w3"], prep["b3"])

    return out2d[:T].reshape(*orig_shape[:-1], dim).astype(out_dtype)


# ----------------------------------------------------------------------------
# Helpers: LLaMA hidden-dim rule, init, reference
# ----------------------------------------------------------------------------
def llama_hidden_dim(dim, multiple_of, ff_dim_multiplier=None):
    hidden_dim = dim * 4
    hidden_dim = int(2 * hidden_dim / 3)
    if ff_dim_multiplier is not None:
        hidden_dim = dim * ff_dim_multiplier
    hidden_dim = multiple_of * ((hidden_dim + multiple_of - 1) // multiple_of)
    return hidden_dim


def init_params(key, dim, hidden):
    # Mimics torch.nn.Linear default init: U(-1/sqrt(fan_in), +1/sqrt(fan_in)).
    k1, k2, k3, k4, k5, k6 = jax.random.split(key, 6)
    lim1 = 1.0 / math.sqrt(dim)
    lim3 = 1.0 / math.sqrt(hidden)
    # Stored as [in, out] (transposed relative to PyTorch's [out, in]).
    w1 = jax.random.uniform(k1, (dim, hidden), jnp.float32, -lim1, lim1)
    b1 = jax.random.uniform(k2, (hidden,), jnp.float32, -lim1, lim1)
    w2 = jax.random.uniform(k3, (dim, hidden), jnp.float32, -lim1, lim1)
    b2 = jax.random.uniform(k4, (hidden,), jnp.float32, -lim1, lim1)
    w3 = jax.random.uniform(k5, (hidden, dim), jnp.float32, -lim3, lim3)
    b3 = jax.random.uniform(k6, (dim,), jnp.float32, -lim3, lim3)
    return w1, b1, w2, b2, w3, b3


def feed_forward_ref(x, w1, b1, w2, b2, w3, b3, compute_dtype=jnp.float32):
    """Reference. With compute_dtype=bf16 it mirrors the kernel's mixed
    precision (bf16 matmul operands, f32 accumulation, f32 elementwise)."""
    xb = x.astype(compute_dtype)
    h1 = jnp.dot(xb, w1.astype(compute_dtype),
                 preferred_element_type=jnp.float32) + b1
    h2 = jnp.dot(xb, w2.astype(compute_dtype),
                 preferred_element_type=jnp.float32) + b2
    gated = (h1 * jax.nn.sigmoid(h1)) * h2
    out = jnp.dot(gated.astype(compute_dtype), w3.astype(compute_dtype),
                  preferred_element_type=jnp.float32) + b3
    return out.astype(x.dtype)


if __name__ == "__main__":
    # Small but lane-aligned shapes: dim=256, multiple_of=128
    #   hidden = 128 * ceil(int(2*1024/3)/128) = 768
    # T = 2*128 = 256 tokens -> the auto-planner halves tm so the parallel
    # token axis has >=2 tiles; hidden is split into >=2 tiles, exercising the
    # f32 accumulator / reduction axis.
    dim = 256
    multiple_of = 128
    hidden = llama_hidden_dim(dim, multiple_of)   # 768
    batch, seq = 2, 128

    key = jax.random.PRNGKey(0)
    kx, kp = jax.random.split(key)
    x = jax.random.normal(kx, (batch, seq, dim), jnp.float32)
    w1, b1, w2, b2, w3, b3 = init_params(kp, dim, hidden)

    # One-time weight prep (model-load time), reused across all forward calls.
    prep = prepare_ffn_weights(w1, b1, w2, b2, w3, b3)

    out = feed_forward_pallas(x, prep)
    out = jax.block_until_ready(out)

    # Kernel-correctness check: same bf16 mixed-precision recipe as the kernel.
    ref_bf16 = feed_forward_ref(x, w1, b1, w2, b2, w3, b3,
                                compute_dtype=jnp.bfloat16)
    # Semantics sanity check vs full-f32 math (loose: bf16 quantization error).
    ref_f32 = feed_forward_ref(x, w1, b1, w2, b2, w3, b3,
                               compute_dtype=jnp.float32)

    assert out.shape == (batch, seq, dim)
    assert jnp.allclose(out, ref_bf16, atol=5e-3, rtol=5e-3), \
        "mismatch vs bf16-matched reference"
    assert jnp.allclose(out, ref_f32, atol=5e-2, rtol=5e-2), \
        "mismatch vs f32 reference"

    print("KERNEL_OK")
</pallas_src>

<mosaic_0001>
module attributes {stable_mosaic.version = 11 : i64} {
  func.func @_swiglu_ffn_kernel(%arg0: i32, %arg1: i32, %arg2: memref<128x256xbf16, #tpu.memory_space<vmem>>, %arg3: memref<1x256x768xbf16, #tpu.memory_space<vmem>>, %arg4: memref<1x1x768xf32, #tpu.memory_space<vmem>>, %arg5: memref<384x256xbf16, #tpu.memory_space<vmem>>, %arg6: memref<1x256xf32, #tpu.memory_space<vmem>>, %arg7: memref<128x256xf32, #tpu.memory_space<vmem>>, %arg8: memref<128x256xf32, #tpu.memory_space<vmem>>) attributes {dimension_semantics = [#tpu.dimension_semantics<parallel>, #tpu.dimension_semantics<arbitrary>], iteration_bounds = array<i64: 2, 2>, scalar_prefetch = 0 : i64, scratch_operands = 1 : i64, tpu.core_type = #tpu.core_type<tc>, window_params = [{transform_indices = @transform_0, window_bounds = array<i64: 128, 256>}, {transform_indices = @transform_1, window_bounds = array<i64: 1, 256, 768>}, {transform_indices = @transform_2, window_bounds = array<i64: 1, 1, 768>}, {transform_indices = @transform_3, window_bounds = array<i64: 384, 256>}, {pipeline_mode = #tpu.pipeline_mode<synchronous>, transform_indices = @transform_4, window_bounds = array<i64: 1, 256>}, {transform_indices = @transform_5, window_bounds = array<i64: 128, 256>}]} {
    %c0_i32 = arith.constant 0 : i32
    %0 = arith.cmpi eq, %arg1, %c0_i32 : i32
    %1 = arith.extui %0 : i1 to i32
    %c0_i32_0 = arith.constant 0 : i32
    %2 = arith.cmpi ne, %1, %c0_i32_0 : i32
    scf.if %2 {
      %cst_17 = arith.constant 0.000000e+00 : f32
      %29 = vector.broadcast %cst_17 : f32 to vector<128x256xf32>
      %c0_18 = arith.constant 0 : index
      %c0_19 = arith.constant 0 : index
      %30 = vector.load %arg8[%c0_18, %c0_19] : memref<128x256xf32, #tpu.memory_space<vmem>>, vector<128x256xf32>
      tpu.vector_store %arg8[%c0_18, %c0_19], %29 {strides = array<i32>} : memref<128x256xf32, #tpu.memory_space<vmem>>, vector<128x256xf32>,
    } else {
    }
    %c0 = arith.constant 0 : index
    %c0_1 = arith.constant 0 : index
    %3 = vector.load %arg2[%c0, %c0_1] : memref<128x256xbf16, #tpu.memory_space<vmem>>, vector<128x256xbf16>
    %c0_2 = arith.constant 0 : index
    %c0_3 = arith.constant 0 : index
    %c0_4 = arith.constant 0 : index
    %4 = vector.load %arg3[%c0_2, %c0_3, %c0_4] : memref<1x256x768xbf16, #tpu.memory_space<vmem>>, vector<1x256x768xbf16>
    %5 = vector.shape_cast %4 : vector<1x256x768xbf16> to vector<256x768xbf16>
    %cst = arith.constant dense<0.000000e+00> : vector<128x768xf32>
    %6 = tpu.matmul %3, %5, %cst {dimension_numbers = #tpu.dot_dimension_numbers<[1], [0], [0], [1], [0, 0, 1, 1], [], []>} : vector<128x256xbf16>, vector<256x768xbf16>, vector<128x768xf32> -> vector<128x768xf32>
    %c0_5 = arith.constant 0 : index
    %c0_6 = arith.constant 0 : index
    %c0_7 = arith.constant 0 : index
    %7 = vector.load %arg4[%c0_5, %c0_6, %c0_7] : memref<1x1x768xf32, #tpu.memory_space<vmem>>, vector<1x1x768xf32>
    %8 = vector.shape_cast %7 : vector<1x1x768xf32> to vector<1x768xf32>
    %9 = vector.broadcast %8 : vector<1x768xf32> to vector<128x768xf32>
    %10 = arith.addf %6, %9 : vector<128x768xf32>
    %11 = vector.extract_strided_slice %10 {offsets = [0, 0], sizes = [128, 384], strides = [1, 1]} : vector<128x768xf32> to vector<128x384xf32>
    %12 = vector.extract_strided_slice %10 {offsets = [0, 384], sizes = [128, 384], strides = [1, 1]} : vector<128x768xf32> to vector<128x384xf32>
    %13 = arith.negf %11 : vector<128x384xf32>
    %14 = math.exp %13 : vector<128x384xf32>
    %cst_8 = arith.constant 1.000000e+00 : f32
    %15 = vector.broadcast %cst_8 : f32 to vector<128x384xf32>
    %16 = arith.addf %15, %14 : vector<128x384xf32>
    %17 = arith.divf %15, %16 : vector<128x384xf32>
    %18 = arith.mulf %11, %17 : vector<128x384xf32>
    %19 = arith.mulf %18, %12 : vector<128x384xf32>
    %c0_9 = arith.constant 0 : index
    %c0_10 = arith.constant 0 : index
    %20 = vector.load %arg8[%c0_9, %c0_10] : memref<128x256xf32, #tpu.memory_space<vmem>>, vector<128x256xf32>
    %21 = arith.truncf %19 : vector<128x384xf32> to vector<128x384xbf16>
    %c0_11 = arith.constant 0 : index
    %c0_12 = arith.constant 0 : index
    %22 = vector.load %arg5[%c0_11, %c0_12] : memref<384x256xbf16, #tpu.memory_space<vmem>>, vector<384x256xbf16>
    %cst_13 = arith.constant dense<0.000000e+00> : vector<128x256xf32>
    %23 = tpu.matmul %21, %22, %cst_13 {dimension_numbers = #tpu.dot_dimension_numbers<[1], [0], [0], [1], [0, 0, 1, 1], [], []>} : vector<128x384xbf16>, vector<384x256xbf16>, vector<128x256xf32> -> vector<128x256xf32>
    %24 = arith.addf %20, %23 : vector<128x256xf32>
    %c0_14 = arith.constant 0 : index
    %c0_15 = arith.constant 0 : index
    %25 = vector.load %arg8[%c0_14, %c0_15] : memref<128x256xf32, #tpu.memory_space<vmem>>, vector<128x256xf32>
    tpu.vector_store %arg8[%c0_14, %c0_15], %24 {strides = array<i32>} : memref<128x256xf32, #tpu.memory_space<vmem>>, vector<128x256xf32>,
    %c1_i32 = arith.constant 1 : i32
    %26 = arith.cmpi eq, %arg1, %c1_i32 : i32
    %27 = arith.extui %26 : i1 to i32
    %c0_i32_16 = arith.constant 0 : i32
    %28 = arith.cmpi ne, %27, %c0_i32_16 : i32
    scf.if %28 {
      %c0_17 = arith.constant 0 : index
      %c0_18 = arith.constant 0 : index
      %29 = vector.load %arg8[%c0_17, %c0_18] : memref<128x256xf32, #tpu.memory_space<vmem>>, vector<128x256xf32>
      %c0_19 = arith.constant 0 : index
      %c0_20 = arith.constant 0 : index
      %30 = vector.load %arg6[%c0_19, %c0_20] : memref<1x256xf32, #tpu.memory_space<vmem>>, vector<1x256xf32>
      %31 = vector.broadcast %30 : vector<1x256xf32> to vector<128x256xf32>
      %32 = arith.addf %29, %31 : vector<128x256xf32>
      %c0_21 = arith.constant 0 : index
      %c0_22 = arith.constant 0 : index
      %33 = vector.load %arg7[%c0_21, %c0_22] : memref<128x256xf32, #tpu.memory_space<vmem>>, vector<128x256xf32>
      tpu.vector_store %arg7[%c0_21, %c0_22], %32 {strides = array<i32>} : memref<128x256xf32, #tpu.memory_space<vmem>>, vector<128x256xf32>,
    } else {
    }
    return
  }
  func.func @transform_0(%arg0: i32, %arg1: i32) -> (i32, i32) {
    %c0_i32 = arith.constant 0 : i32
    %c0_i32_0 = arith.constant 0 : i32
    return %arg0, %c0_i32 : i32, i32
  }
  func.func @transform_1(%arg0: i32, %arg1: i32) -> (i32, i32, i32) {
    %c0_i32 = arith.constant 0 : i32
    %c0_i32_0 = arith.constant 0 : i32
    %c0_i32_1 = arith.constant 0 : i32
    return %arg1, %c0_i32, %c0_i32_0 : i32, i32, i32
  }
  func.func @transform_2(%arg0: i32, %arg1: i32) -> (i32, i32, i32) {
    %c0_i32 = arith.constant 0 : i32
    %c0_i32_0 = arith.constant 0 : i32
    %c0_i32_1 = arith.constant 0 : i32
    return %arg1, %c0_i32, %c0_i32_0 : i32, i32, i32
  }
  func.func @transform_3(%arg0: i32, %arg1: i32) -> (i32, i32) {
    %c0_i32 = arith.constant 0 : i32
    %c0_i32_0 = arith.constant 0 : i32
    return %arg1, %c0_i32 : i32, i32
  }
  func.func @transform_4(%arg0: i32, %arg1: i32) -> (i32, i32) {
    %c0_i32 = arith.constant 0 : i32
    %c0_i32_0 = arith.constant 0 : i32
    %c0_i32_1 = arith.constant 0 : i32
    return %c0_i32, %c0_i32_0 : i32, i32
  }
  func.func @transform_5(%arg0: i32, %arg1: i32) -> (i32, i32) {
    %c0_i32 = arith.constant 0 : i32
    %c0_i32_0 = arith.constant 0 : i32
    return %arg0, %c0_i32 : i32, i32
  }
}

</mosaic_0001>

<bundles_post_ra>
// kernel: tpu_custom_call.1
= control target key start
LH: loop header
LB: loop body
LE: loop exit
PB: predicated region body
PF: predicated region fallthrough
CT: control target
= control target key end

     0   :  { %s5352_s0 = inlined_call_operand.hbm [shape: bf16[256,256], index: 0, kind: input, shape index: {}]   ;;  %s5353_s1 = inlined_call_operand.hbm [shape: bf16[2,256,768], index: 1, kind: input, shape index: {}]   ;;  %s5354_s2 = inlined_call_operand.hbm [shape: f32[2,1,768], index: 2, kind: input, shape index: {}]   ;;  %s5355_s3 = inlined_call_operand.hbm [shape: bf16[768,256], index: 3, kind: input, shape index: {}]   ;;  %s5356_s4 = inlined_call_operand.hbm [shape: f32[1,256], index: 4, kind: input, shape index: {}]   ;;  %s5357_s5 = inlined_call_operand.hbm [shape: f32[256,256], index: 5, kind: output, shape index: {}]  }
   0x1   :  { %5399 = sst [smem:[#allocation50_spill]] %s5352_s0 }
   0x2   :  { %5400 = sst [smem:[#allocation51_spill]] %s5353_s1 }
   0x3   :  { %5401 = sst [smem:[#allocation52_spill]] %s5356_s4 }
   0x4   :  { %5402 = sst [smem:[#allocation53_spill]] %s5357_s5 }
   0x5   :  { %10 = vsyncpa [#allocation4], 0 }
   0x6   :  { %12 = vsyncpa [#allocation4 + $0x1], 0 }
   0x7   :  { %13 = vsyncpa [#allocation7], 0 }
   0x8   :  { %15 = vsyncpa [#allocation7 + $0x1], 0 }
   0x9   :  { %16 = vsyncpa [#allocation10], 0 }
   0xa   :  { %18 = vsyncpa [#allocation10 + $0x1], 0 }
   0xb   :  { %19 = vsyncpa [#allocation5], 0 }
   0xc   :  { %21 = vsyncpa [#allocation5 + $0x1], 0  ;;  %s3979_s18 = smov 0   ;;  %s3981_s19 = smov 0  }
   0xd   :  { %s3983_s20 = smov 0   ;;  %s3985_s21 = smov 0  }
   0xe   :  { %s3987_s22 = smov 0   ;;  %s3989_s23 = smov 0  }
   0xf   :  { %s3991_s24 = smov 0   ;;  %s3993_s25 = smov 0  }
  0x10   :  { %s3995_s26 = smov 0   ;;  %s3997_s27 = smov 0  }
  0x11   :  { %s3999_s28 = smov 0  }
  0x12 LB: > { %5403 = sst [smem:[#allocation18_spill]] %s3905_s21  ;;  %s4033_s29 = sadd.s32 4294967295, %s3933_s28   ;;  %s3933_s28 = sphi %s3999_s28, %s27_s28   ;;  %s3929_s27 = sphi %s3997_s27, %s5505_s27   ;;  %s3925_s26 = sphi %s3995_s26, %s5513_s26   ;;  %s3921_s25 = sphi %s3993_s25, %s5503_s25   ;;  %s3917_s24 = sphi %s3991_s24, %s5512_s24   ;;  %s3913_s23 = sphi %s3989_s23, %s5511_s23   ;;  %s3909_s22 = sphi %s3987_s22, %s5510_s22   ;;  %s3905_s21 = sphi %s3985_s21, %s5509_s21   ;;  %s3901_s20 = sphi %s3983_s20, %s5508_s20   ;;  %s3897_s19 = sphi %s3981_s19, %s5507_s19   ;;  %s3893_s18 = sphi %s3979_s18, %s5506_s18  }
  0x13   : > { %5404 = sst [smem:[#allocation19_spill]] %s3917_s24  ;;  %s2772_s30 = sadd.s32 4294967294, %s3933_s28  }
  0x14   : > { %5405 = sst [smem:[#allocation20_spill]] %s3921_s25  ;;  %p5358_p0 = scmp.eq.s32.totalorder %s3933_s28, 0 }
  0x15   : > { %5406 = sst [smem:[#allocation21_spill]] %s3929_s27  ;;  %p59_p1 = scmp.ne.s32.totalorder %s3909_s22, %s3905_s21 }
  0x16   : > { %p5359_p2 = scmp.ne.s32.totalorder %s3913_s23, %s3909_s22  ;;  %p5365_p3 = scmp.eq.s32.totalorder %s4033_s29, 0 }
  0x17   : > { %p79_p4 = scmp.ne.s32.totalorder %s3901_s20, %s3897_s19  ;;  %p85_p6 = scmp.ne.s32.totalorder %s3897_s19, %s3893_s18 }
  0x18   : > { %p4051_p5 = por %p5365_p3, %p59_p1  ;;  %p182_p8 = scmp.eq.s32.totalorder %s4033_s29, 3 }
  0x19   : > { %p4058_p7 = por %p79_p4, %p5358_p0  ;;  %p4065_p9 = por %p85_p6, %p5365_p3 }
  0x1a   : > { %s5407_s8 = scalar_select %p4051_p5, 1, 0 }
  0x1b   : > { %s5408_s9 = scalar_select %p4058_p7, 1, 0 }
  0x1c   : > { %s5409_s10 = scalar_select %p4065_p9, 1, 0 }
  0x1d   : > { %p188_p10 = scmp.eq.s32.totalorder %s2772_s30, 3  ;;  %p4072_p11 = por %p182_p8, %p5359_p2 }
  0x1e   : > { %5410 = sst [smem:[#allocation22_spill]] %s5409_s10  ;;  %p2773_p12 = scmp.ge.s32.totalorder %s3933_s28, 1 }
  0x1f   : > { %s5411_s11 = scalar_select %p4072_p11, 1, 0 }
  0x20   : > { %p4080_p13 = por %p188_p10, %p59_p1  ;;  %p195_p4 = scmp.lt.s32.totalorder %s3933_s28, 5 }
  0x21   : > { %5412 = sst [smem:[#allocation23_spill]] %s5411_s11  ;;  %s3935_s14 = smov [#allocation11]  }
  0x22   : > { %s5413_s12 = scalar_select %p4080_p13, 1, 0 }
  0x23   : > { %p4085_p0 = pnand %p2773_p12, %p195_p4  ;;  %s208_s15 = sshll.u32 %s3935_s14, 4  ;;  %s209_s15 = int_to_ptr.vmem [resolvable:$true] %s208_s15 }
  0x24   : > { %5414 = sst [smem:[#allocation24_spill]] %s5413_s12  ;;  %s5370_s18 = sand.u32 1, %s3933_s28  }
  0x25   : > { %s5415_s13 = scalar_select %p4085_p0, 1, 0 }
  0x26   : > { %p3097_p6 = pneg %p4085_p0  ;;  %s4101_s30 = sand.u32 1, %s3901_s20  }
  0x27   : > { %s5417_s4 = sld [smem:[#allocation52_spill]] }
  0x28   : > { %p4094_p2 = pnand %p3097_p6, %p5365_p3 }
  0x2a   : > { %p3653_p10 = pneg %p4094_p2 }
  0x2d   : > { %s3651_s12 = scalar_lea.hbm %s5417_s4, 32 }
  0x2e   : > { %p3652_p1 = scmp.ne.s32.totalorder %s5417_s4, %s3651_s12  ;;  %p3658_p6 = scmp.lt.u32.totalorder %s3651_s12, %s5417_s4 }
  0x30   : > { %p3654_p12 = pnand %p3653_p10, %p3652_p1 }
  0x32   : > { %p3655_p4 = pneg %p3654_p12 }
  0x34   : > { %p3660_p3 = pnand %p3658_p6, %p3655_p4 }
  0x36   : > { %3663 = shalt.err (!%p3660_p3)
}
  0x37   : > { %s3664_s17 = scalar_lea.vmem %s209_s15, 32  ;;  %p3672_p9 = scmp.lt.s32.totalorder %s209_s15, %s209_s15 }
  0x38   : > { %p3665_p8 = scmp.ne.s32.totalorder %s209_s15, %s3664_s17  ;;  %p3673_p5 = scmp.lt.s32.totalorder %s3664_s17, %s3664_s17 }
  0x3a   : > { %p3667_p13 = pnand %p3665_p8, %p3653_p10  ;;  %p3674_p0 = por %p3673_p5, %p3672_p9 }
  0x3c   : > { %p3668_p11 = pneg %p3667_p13 }
  0x3e   : > { %p3675_p7 = pnand %p3674_p0, %p3668_p11 }
  0x40   : > { %3678 = shalt.err (!%p3675_p7)
}
  0x41   : > { %3100 = dma.hbm_to_vmem [thread:$0]  (!%p4094_p2), %s5417_s4, 32, %s209_s15, [#allocation10]  }
  0x42   : > { %s3075_s5 = smul.u32 768, %s4101_s30  ;;  %p5418_p3 = scmp.ne.s32.totalorder %s5408_s9, 0 }
  0x43   : > { %p5419_p8 = scmp.lt.s32.totalorder %s3933_s28, 4  ;;  %s3076_s11 = smul.u32 12288, %s3925_s26 }
  0x44   : > { %s5421_s1 = sld [smem:[#allocation51_spill]]  ;;  %s245_s14 = scalar_lea.vmem [#allocation6], %s3075_s5 }
  0x45   : > { %p4124_p13 = pnand %p5419_p8, %p5418_p3  ;;  %s252_s15 = sshll.u32 %s245_s14, 4  ;;  %s4134_s15 = int_to_ptr.vmem [resolvable:$true] %s252_s15 }
  0x46   : > { %s4138_s9 = scalar_lea.sflag [#allocation7], %s5370_s18 }
  0x47   : > { %s5420_s7 = scalar_select %p4124_p13, 1, 0 }
  0x48   : > { %p4144_p2 = pneg %p4124_p13 }
  0x4a   : > { %s4132_s17 = scalar_lea.hbm %s5421_s1, %s3076_s11  ;;  %s3684_s5 = scalar_lea.hbm %s5421_s1, 24576 }
  0x4b   : > { %s3679_s21 = scalar_lea.hbm %s4132_s17, 12288  ;;  %p3685_p9 = scmp.lt.u32.totalorder %s4132_s17, %s5421_s1 }
  0x4c   : > { %p3680_p0 = scmp.ne.s32.totalorder %s4132_s17, %s3679_s21  ;;  %p3686_p11 = scmp.lt.u32.totalorder %s3684_s5, %s3679_s21 }
  0x4d   : > { %p3688_p10 = scmp.lt.u32.totalorder %s3679_s21, %s4132_s17 }
  0x4e   : > { %p3682_p5 = pnand %p4144_p2, %p3680_p0  ;;  %p3687_p1 = por %p3686_p11, %p3685_p9 }
  0x50   : > { %p3683_p7 = pneg %p3682_p5  ;;  %p3689_p12 = por %p3688_p10, %p3687_p1 }
  0x52   : > { %p3690_p4 = pnand %p3689_p12, %p3683_p7 }
  0x54   : > { %3693 = shalt.err (!%p3690_p4)
}
  0x55   : > { %s3694_s18 = scalar_lea.vmem %s4134_s15, 12288  ;;  %s3936_s11 = smov [#allocation6]  }
  0x56   : > { %p3695_p6 = scmp.ne.s32.totalorder %s4134_s15, %s3694_s18  ;;  %s3699_s12 = sshll.u32 %s3936_s11, 4  ;;  %s3700_s12 = int_to_ptr.vmem [resolvable:$false] %s3699_s12 }
  0x57   : > { %s3701_s16 = scalar_lea.vmem %s3700_s12, 24576  ;;  %p3702_p0 = scmp.lt.s32.totalorder %s4134_s15, %s3700_s12 }
  0x58   : > { %p3697_p3 = pnand %p3695_p6, %p4144_p2  ;;  %p3703_p5 = scmp.lt.s32.totalorder %s3701_s16, %s3694_s18 }
  0x5a   : > { %p3698_p8 = pneg %p3697_p3  ;;  %p3704_p9 = por %p3703_p5, %p3702_p0 }
  0x5c   : > { %p3705_p11 = pnand %p3704_p9, %p3698_p8 }
  0x5e   : > { %3708 = shalt.err (!%p3705_p11)
}
  0x5f   : > { %s3937_s21 = smov 384   ;;  %s3938_s18 = smov 24  }
  0x60   : > { %3107 = dma.hbm_to_vmem [thread:$0]  (!%p4124_p13), %s4132_s17, 12288, %s4134_s15, %s4138_s9, %s3937_s21, %s3937_s21, %s3938_s18  }
  0x61   : > { %p5423_p7 = scmp.ne.s32.totalorder %s3913_s23, %s3909_s22  ;;  %p5424_p1 = scmp.eq.s32.totalorder %s3933_s28, 0 }
  0x62   : > { %s5426_s14 = sadd.s32 1, %s3925_s26  ;;  %s39_s11 = sadd.s32 1, %s3929_s27 }
  0x63   : > { %p4173_p10 = por %p5424_p1, %p5423_p7  ;;  %p37_p12 = scmp.ge.s32.totalorder %s5426_s14, 2 }
  0x64   : > { %s219_s12 = sand.u32 1, %s3913_s23   ;;  %s5427_s16 = smov %s5426_s14 }
  0x65   : > { %s5515_s16 = smov (%p37_p12, %s5427_s16), 0  ;;  %s5517_s11 = smov (!%p37_p12, %s39_s11), %s3929_s27 }
  0x66   : > { %5428 = sst [smem:[#allocation25_spill]] %s5515_s16  ;;  %s69_s17 = ssub.s32 %s3925_s26, %s5515_s16 }
  0x67   : > { %p41_p4 = scmp.ge.s32.totalorder %s5517_s11, 2  ;;  %p70_p6 = scmp.eq.s32.totalorder %s69_s17, 0 }
  0x68   : > { %s2776_s15 = sshll.u32 %s219_s12, 7  ;;  %s3005_s21 = sshll.u32 %s3929_s27, 11 }
  0x69   : > { %s5519_s11 = smov (%p41_p4, %s5517_s11), 0  ;;  %s5430_s18 = sadd.s32 1, %s3901_s20 }
  0x6a   : > { %5429 = sst [smem:[#allocation26_spill]] %s5519_s11  ;;  %s43_s1 = ssub.s32 %s3929_s27, %s5519_s11 }
  0x6b   : > { %s4194_s14 = scalar_select %p70_p6, %s3901_s20, %s5430_s18  }
  0x6c   : > { %p44_p3 = scmp.eq.s32.totalorder %s43_s1, 0  ;;  %s5431_s0 = sld [smem:[#allocation50_spill]] }
  0x6d   : > { %s223_s17 = scalar_lea.vmem [#allocation3], %s2776_s15  ;;  %p5432_p8 = scmp.lt.s32.totalorder %s3933_s28, 4 }
  0x6e   : > { %s231_s16 = sshll.u32 %s223_s17, 4  ;;  %s5434_s18 = sadd.s32 1, %s3913_s23  ;;  %s4216_s16 = int_to_ptr.vmem [resolvable:$true] %s231_s16 }
  0x6f   : > { %p4207_p0 = pnand %p5432_p8, %p4173_p10  ;;  %s4218_s4 = scalar_lea.sflag [#allocation4], %s219_s12 }
  0x70   : > { %s4214_s1 = scalar_select %p44_p3, %s3913_s23, %s5434_s18  }
  0x71   : > { %p3711_p9 = pneg %p4207_p0 }
  0x72   : > { %s4201_s24 = scalar_lea.hbm %s5431_s0, %s3005_s21  ;;  %s3714_s21 = scalar_lea.hbm %s5431_s0, 4096 }
  0x73   : > { %s3709_s25 = scalar_lea.hbm %s4201_s24, 2048  ;;  %p3715_p1 = scmp.lt.u32.totalorder %s4201_s24, %s5431_s0 }
  0x74   : > { %p3710_p5 = scmp.ne.s32.totalorder %s4201_s24, %s3709_s25  ;;  %p3716_p10 = scmp.lt.u32.totalorder %s3714_s21, %s3709_s25 }
  0x75   : > { %p3718_p4 = scmp.lt.u32.totalorder %s3709_s25, %s4201_s24 }
  0x76   : > { %p3712_p11 = pnand %p3711_p9, %p3710_p5  ;;  %p3717_p12 = por %p3716_p10, %p3715_p1 }
  0x78   : > { %p3713_p7 = pneg %p3712_p11  ;;  %p3719_p6 = por %p3718_p4, %p3717_p12 }
  0x7a   : > { %p3720_p3 = pnand %p3719_p6, %p3713_p7 }
  0x7c   : > { %3723 = shalt.err (!%p3720_p3)
}
  0x7d   : > { %s3724_s12 = scalar_lea.vmem %s4216_s16, 2048  ;;  %s3939_s18 = smov [#allocation3]  }
  0x7e   : > { %p3725_p8 = scmp.ne.s32.totalorder %s4216_s16, %s3724_s12  ;;  %s3729_s5 = sshll.u32 %s3939_s18, 4  ;;  %s3730_s5 = int_to_ptr.vmem [resolvable:$false] %s3729_s5 }
  0x7f   : > { %s3731_s11 = scalar_lea.vmem %s3730_s5, 4096  ;;  %p3732_p13 = scmp.lt.s32.totalorder %s4216_s16, %s3730_s5 }
  0x80   : > { %p3727_p5 = pnand %p3725_p8, %p3711_p9  ;;  %p3733_p1 = scmp.lt.s32.totalorder %s3731_s11, %s3724_s12 }
  0x82   : > { %p3728_p11 = pneg %p3727_p5  ;;  %p3734_p10 = por %p3733_p1, %p3732_p13 }
  0x84   : > { %p3735_p12 = pnand %p3734_p10, %p3728_p11 }
  0x86   : > { %3738 = shalt.err (!%p3735_p12)
}
  0x87   : > { %s5378_s25 = smov 128   ;;  %s3941_s15 = smov 8  }
  0x88   : > { %3104 = dma.hbm_to_vmem [thread:$0]  (!%p4207_p0), %s4201_s24, 2048, %s4216_s16, %s4218_s4, %s5378_s25, %s5378_s25, %s3941_s15  }
  0x89   : > { %s3077_s21 = smul.u32 6, %s4101_s30  ;;  %s3744_s4 = scalar_lea.hbm %s5354_s2, 192 }
  0x8a   : > { %s3078_s17 = smul.u32 96, %s3925_s26 }
  0x8b   : > { %s3079_s12 = smul.u32 384, %s4101_s30  ;;  %s266_s0 = scalar_lea.vmem [#allocation8], %s3077_s21 }
  0x8c   : > { %s4255_s11 = scalar_lea.hbm %s5354_s2, %s3078_s17  ;;  %s274_s27 = sshll.u32 %s266_s0, 4  ;;  %s275_s27 = int_to_ptr.vmem [resolvable:$true] %s274_s27 }
  0x8d   : > { %s3739_s10 = scalar_lea.hbm %s4255_s11, 96  ;;  %p3745_p7 = scmp.lt.u32.totalorder %s4255_s11, %s5354_s2 }
  0x8e   : > { %p3740_p13 = scmp.ne.s32.totalorder %s4255_s11, %s3739_s10  ;;  %p3746_p4 = scmp.lt.u32.totalorder %s3744_s4, %s3739_s10 }
  0x8f   : > { %p3748_p3 = scmp.lt.u32.totalorder %s3739_s10, %s4255_s11 }
  0x90   : > { %p3742_p9 = pnand %p3740_p13, %p4144_p2  ;;  %p3747_p6 = por %p3746_p4, %p3745_p7 }
  0x92   : > { %p3743_p0 = pneg %p3742_p9  ;;  %p3749_p8 = por %p3748_p3, %p3747_p6 }
  0x94   : > { %p3750_p5 = pnand %p3749_p8, %p3743_p0 }
  0x96   : > { %3753 = shalt.err (!%p3750_p5)
}
  0x97   : > { %s3754_s0 = scalar_lea.vmem %s275_s27, 96  ;;  %s3942_s21 = smov [#allocation8]  }
  0x98   : > { %p3755_p11 = scmp.ne.s32.totalorder %s275_s27, %s3754_s0  ;;  %s3759_s17 = sshll.u32 %s3942_s21, 4  ;;  %s3760_s17 = int_to_ptr.vmem [resolvable:$false] %s3759_s17 }
  0x99   : > { %s3761_s5 = scalar_lea.vmem %s3760_s17, 192  ;;  %p3762_p12 = scmp.lt.s32.totalorder %s275_s27, %s3760_s17 }
  0x9a   : > { %p3757_p1 = pnand %p3755_p11, %p4144_p2  ;;  %p3763_p13 = scmp.lt.s32.totalorder %s3761_s5, %s3754_s0 }
  0x9c   : > { %p3758_p10 = pneg %p3757_p1  ;;  %p3764_p9 = por %p3763_p13, %p3762_p12 }
  0x9e   : > { %p3765_p4 = pnand %p3764_p9, %p3758_p10 }
  0xa0   : > { %3768 = shalt.err (!%p3765_p4)
}
  0xa1   : > { %p5435_p7 = scmp.ne.s32.totalorder %s5420_s7, 0  ;;  %s3010_s25 = smul.u32 6144, %s3925_s26 }
  0xa2   : > { %s285_s10 = scalar_lea.vmem [#allocation9], %s3079_s12  ;;  %s5436_s0 = sand.u32 1, %s3933_s28  }
  0xa3   : > { %3110 = dma.hbm_to_vmem [thread:$0]  (!%p5435_p7), %s4255_s11, 96, %s275_s27, %s4138_s9  }
  0xa4   : > { %s293_s24 = sshll.u32 %s285_s10, 4  ;;  %s4283_s18 = scalar_lea.hbm %s5355_s3, %s3010_s25  ;;  %s4278_s24 = int_to_ptr.vmem [resolvable:$true] %s293_s24 }
  0xa5   : > { %s4287_s21 = scalar_lea.sflag [#allocation10], %s5436_s0  ;;  %s3769_s17 = scalar_lea.hbm %s4283_s18, 6144 }
  0xa6   : > { %p3770_p0 = scmp.ne.s32.totalorder %s4283_s18, %s3769_s17  ;;  %s3774_s9 = scalar_lea.hbm %s5355_s3, 12288 }
  0xa7   : > { %p3775_p8 = scmp.lt.u32.totalorder %s4283_s18, %s5355_s3  ;;  %p3776_p5 = scmp.lt.u32.totalorder %s3774_s9, %s3769_s17 }
  0xa8   : > { %p3772_p6 = pnand %p3770_p0, %p4144_p2  ;;  %p3778_p1 = scmp.lt.u32.totalorder %s3769_s17, %s4283_s18 }
  0xa9   : > { %p3777_p11 = por %p3776_p5, %p3775_p8 }
  0xaa   : > { %p3773_p3 = pneg %p3772_p6 }
  0xab   : > { %p3779_p10 = por %p3778_p1, %p3777_p11 }
  0xad   : > { %p3780_p12 = pnand %p3779_p10, %p3773_p3 }
  0xaf   : > { %3783 = shalt.err (!%p3780_p12)
}
  0xb0   : > { %s3784_s5 = scalar_lea.vmem %s4278_s24, 6144  ;;  %s3943_s25 = smov [#allocation9]  }
  0xb1   : > { %p3785_p13 = scmp.ne.s32.totalorder %s4278_s24, %s3784_s5  ;;  %s3789_s10 = sshll.u32 %s3943_s25, 4  ;;  %s3790_s10 = int_to_ptr.vmem [resolvable:$false] %s3789_s10 }
  0xb2   : > { %s3791_s16 = scalar_lea.vmem %s3790_s10, 12288  ;;  %p3792_p0 = scmp.lt.s32.totalorder %s4278_s24, %s3790_s10 }
  0xb3   : > { %p3787_p9 = pnand %p3785_p13, %p4144_p2  ;;  %p3793_p6 = scmp.lt.s32.totalorder %s3791_s16, %s3784_s5 }
  0xb5   : > { %p3788_p4 = pneg %p3787_p9  ;;  %p3794_p8 = por %p3793_p6, %p3792_p0 }
  0xb7   : > { %p3795_p5 = pnand %p3794_p8, %p3788_p4 }
  0xb9   : > { %3798 = shalt.err (!%p3795_p5)
}
  0xba   : > { %s5437_s4 = smov 128   ;;  %p5438_p2 = scmp.ne.s32.totalorder %s5415_s13, 0 }
  0xbb   : > { %3113 = dma.hbm_to_vmem [thread:$0]  (!%p5435_p7), %s4283_s18, 6144, %s4278_s24, %s4287_s21, %s5437_s4, %s5437_s4, %s3941_s15  }
  0xbc   : > { %305 = sbr.rel (%p5438_p2) target bundleno = 967 (0x3c7), region = 40 }
  0xc3   : > { %s4317_s6 = sand.u32 1, %s3909_s22   ;;  %p5439_p3 = scmp.ne.s32.totalorder %s5407_s8, 0 }
  0xc4   : > { %s2785_s0 = sshll.u32 %s4317_s6, 7  ;;  %s308_s17 = scalar_lea.sflag [#allocation4], %s4317_s6 }
  0xc5   : > { %s4321_s27 = scalar_lea.vmem [#allocation3], %s2785_s0 }
  0xc6   : > { %3872 = dma.done.wait (%p5439_p3), %s308_s17, 2048  }
  0xc7   : > { %3874 = vsyncadd (%p5439_p3), %s308_s17, 4294965248  ;;  %s5440_s7 = sld [smem:[#allocation22_spill]]  ;;  %s316_s13 = sand.u32 1, %s4033_s29  }
  0xc8   : > { %s318_s15 = sand.u32 1, %s3897_s19   ;;  %s317_s18 = scalar_lea.sflag [#allocation7], %s316_s13 }
  0xc9   : > { %s3080_s24 = smul.u32 768, %s318_s15 }
  0xcb   : > { %s4329_s21 = scalar_lea.vmem [#allocation6], %s3080_s24 }
  0xcd   : > { %p5441_p7 = scmp.ne.s32.totalorder %s5440_s7, 0 }
  0xcf   : > { %3876 = dma.done.wait (%p5441_p7), %s317_s18, 12384  }
  0xd0   : > { %3878 = vsyncadd (%p5441_p7), %s317_s18, 4294954912  ;;  %s3081_s30 = smul.u32 6, %s318_s15  ;;  %s335_s8 = scalar_lea.sflag [#allocation10], %s316_s13 }
  0xd1   : > { %s3082_s9 = smul.u32 384, %s318_s15 }
  0xd2   : > { %s4335_s12 = scalar_lea.vmem [#allocation8], %s3081_s30 }
  0xd3   : > { %s4337_s11 = scalar_lea.vmem [#allocation9], %s3082_s9 }
  0xd4   : > { %3880 = dma.done.wait (%p5441_p7), %s335_s8, 6144  }
  0xd5   : > { %3882 = vsyncadd (%p5441_p7), %s335_s8, 4294961152  ;;  %p5442_p11 = scmp.eq.s32.totalorder %s4033_s29, 0 }
  0xd7   : > { %3884 = dma.done.wait (%p5442_p11), [#allocation10], 32   ;;  %p5443_p1 = pmov %p5442_p11 }
  0xd8   : > { %s2787_s5 = sshll.u32 %s4317_s6, 8  ;;  %s5444_s10 = sld [smem:[#allocation19_spill]] }
  0xd9   : > { %3886 = vsyncadd (%p5443_p1), [#allocation10], 4294967264  ;;  %s4348_s25 = scalar_lea.vmem [#allocation12], %s2787_s5 }
  0xde   : > { %p2788_p10 = scmp.ne.s32.totalorder %s5444_s10, 0 }
  0xdf   : > { %v3944_v0 = vmov (!%p2788_p10), 0.0  }
  0xe0   : > { %391 = sbr.rel (%p2788_p10) target bundleno = 240 (0xf0), region = 64  ;;  %392 = vst [vmem:[#allocation2] sm:$0xff] (!%p2788_p10), %v3944_v0  ;;  %393 = vst [vmem:[#allocation2 + $0x8] sm:$0xff] (!%p2788_p10), %v3944_v0 }
  0xe1   : > { %394 = vst [vmem:[#allocation2 + $0x10] sm:$0xff] (!%p2788_p10), %v3944_v0  ;;  %395 = vst [vmem:[#allocation2 + $0x18] sm:$0xff] (!%p2788_p10), %v3944_v0 }
  0xe2   : > { %396 = vst [vmem:[#allocation2 + $0x20] sm:$0xff] (!%p2788_p10), %v3944_v0  ;;  %397 = vst [vmem:[#allocation2 + $0x28] sm:$0xff] (!%p2788_p10), %v3944_v0 }
  0xe3   : > { %398 = vst [vmem:[#allocation2 + $0x30] sm:$0xff] (!%p2788_p10), %v3944_v0  ;;  %399 = vst [vmem:[#allocation2 + $0x38] sm:$0xff] (!%p2788_p10), %v3944_v0 }
  0xe4   : > { %400 = vst [vmem:[#allocation2 + $0x40] sm:$0xff] (!%p2788_p10), %v3944_v0  ;;  %401 = vst [vmem:[#allocation2 + $0x48] sm:$0xff] (!%p2788_p10), %v3944_v0 }
  0xe5   : > { %402 = vst [vmem:[#allocation2 + $0x50] sm:$0xff] (!%p2788_p10), %v3944_v0  ;;  %403 = vst [vmem:[#allocation2 + $0x58] sm:$0xff] (!%p2788_p10), %v3944_v0 }
  0xe6   : > { %404 = vst [vmem:[#allocation2 + $0x60] sm:$0xff] (!%p2788_p10), %v3944_v0  ;;  %405 = vst [vmem:[#allocation2 + $0x68] sm:$0xff] (!%p2788_p10), %v3944_v0 }
  0xe7   : > { %406 = vst [vmem:[#allocation2 + $0x70] sm:$0xff] %v3944_v0  ;;  %407 = vst [vmem:[#allocation2 + $0x78] sm:$0xff] %v3944_v0 }
  0xe8   : > { %408 = vst [vmem:[#allocation2 + $0x80] sm:$0xff] %v3944_v0  ;;  %409 = vst [vmem:[#allocation2 + $0x88] sm:$0xff] %v3944_v0 }
  0xe9   : > { %410 = vst [vmem:[#allocation2 + $0x90] sm:$0xff] %v3944_v0  ;;  %411 = vst [vmem:[#allocation2 + $0x98] sm:$0xff] %v3944_v0 }
  0xea   : > { %412 = vst [vmem:[#allocation2 + $0xa0] sm:$0xff] %v3944_v0  ;;  %413 = vst [vmem:[#allocation2 + $0xa8] sm:$0xff] %v3944_v0 }
  0xeb   : > { %414 = vst [vmem:[#allocation2 + $0xb0] sm:$0xff] %v3944_v0  ;;  %415 = vst [vmem:[#allocation2 + $0xb8] sm:$0xff] %v3944_v0 }
  0xec   : > { %416 = vst [vmem:[#allocation2 + $0xc0] sm:$0xff] %v3944_v0  ;;  %417 = vst [vmem:[#allocation2 + $0xc8] sm:$0xff] %v3944_v0 }
  0xed   : > { %418 = vst [vmem:[#allocation2 + $0xd0] sm:$0xff] %v3944_v0  ;;  %419 = vst [vmem:[#allocation2 + $0xd8] sm:$0xff] %v3944_v0 }
  0xee   : > { %420 = vst [vmem:[#allocation2 + $0xe0] sm:$0xff] %v3944_v0  ;;  %421 = vst [vmem:[#allocation2 + $0xe8] sm:$0xff] %v3944_v0 }
  0xef   : > { %422 = vst [vmem:[#allocation2 + $0xf0] sm:$0xff] %v3944_v0  ;;  %423 = vst [vmem:[#allocation2 + $0xf8] sm:$0xff] %v3944_v0 }
  0xf0 PF: > { %v3219_v1 = vld [vmem:[%s4329_s21 + $0x4] ss:$24 sps:$4 sm:$0xff]   ;;  %v3221_v2 = vld [vmem:[%s4329_s21] ss:$24 sps:$4 sm:$0xff]   ;;  %v3222_v3 = vld [vmem:[%s4329_s21 + $0x34] ss:$24 sps:$4 sm:$0xff]  }
  0xf1   : > { %1128 = vmatprep.subr.bf16.mxu0 %v3219_v1  ;;  %v3224_v4 = vld [vmem:[%s4329_s21 + $0x30] ss:$24 sps:$4 sm:$0xff]   ;;  %v3225_v5 = vld [vmem:[%s4329_s21 + $0x64] ss:$24 sps:$4 sm:$0xff]   ;;  %v3227_v6 = vld [vmem:[%s4329_s21 + $0x60] ss:$24 sps:$4 sm:$0xff]  }
  0xf2   : > { %1129 = vmatpush1.bf16.msra.mxu0 %v3221_v2  ;;  %v3228_v7 = vld [vmem:[%s4329_s21 + $0x94] ss:$24 sps:$4 sm:$0xff]   ;;  %v3230_v9 = vld [vmem:[%s4329_s21 + $0x90] ss:$24 sps:$4 sm:$0xff]   ;;  %v3231_v10 = vld [vmem:[%s4329_s21 + $0xc4] ss:$24 sps:$4 sm:$0xff]  }
  0xf3   : > { %1130 = vmatprep.subr.bf16.mxu0 %v3222_v3  ;;  %v3240_v8 = vld [vmem:[%s4329_s21 + $0xc] ss:$24 sps:$4 sm:$0xff]   ;;  %v3244_v11 = vld [vmem:[%s4329_s21 + $0x8] ss:$24 sps:$4 sm:$0xff]   ;;  %v3246_v12 = vld [vmem:[%s4329_s21 + $0x3c] ss:$24 sps:$4 sm:$0xff]  }
  0xf4   : > { %1241 = vmatprep.subr.bf16.mxu1 %v3240_v8  ;;  %v3233_v13 = vld [vmem:[%s4329_s21 + $0xc0] ss:$24 sps:$4 sm:$0xff]   ;;  %v3252_v15 = vld [vmem:[%s4329_s21 + $0x6c] ss:$24 sps:$4 sm:$0xff]   ;;  %v3258_v18 = vld [vmem:[%s4329_s21 + $0x9c] ss:$24 sps:$4 sm:$0xff]  }
  0xf5   : > { %1242 = vmatpush1.bf16.msra.mxu1 %v3244_v11  ;;  %v3250_v14 = vld [vmem:[%s4329_s21 + $0x38] ss:$24 sps:$4 sm:$0xff]   ;;  %v3234_v16 = vld [vmem:[%s4329_s21 + $0xf4] ss:$24 sps:$4 sm:$0xff]   ;;  %v3256_v17 = vld [vmem:[%s4329_s21 + $0x68] ss:$24 sps:$4 sm:$0xff]  }
  0xf6   : > { %1131 = vmatpush1.bf16.msra.mxu0 %v3224_v4  ;;  %1243 = vmatprep.subr.bf16.mxu1 %v3246_v12  ;;  %v3236_v19 = vld [vmem:[%s4329_s21 + $0xf0] ss:$24 sps:$4 sm:$0xff]   ;;  %v3237_v20 = vld [vmem:[%s4329_s21 + $0x124] ss:$24 sps:$4 sm:$0xff]   ;;  %v3239_v23 = vld [vmem:[%s4329_s21 + $0x120] ss:$24 sps:$4 sm:$0xff]  }
  0xf7   : > { %1132 = vmatprep.subr.bf16.mxu0 %v3225_v5  ;;  %v3262_v21 = vld [vmem:[%s4329_s21 + $0x98] ss:$24 sps:$4 sm:$0xff]   ;;  %v3264_v22 = vld [vmem:[%s4329_s21 + $0xcc] ss:$24 sps:$4 sm:$0xff]   ;;  %v3268_v25 = vld [vmem:[%s4329_s21 + $0xc8] ss:$24 sps:$4 sm:$0xff]  }
  0xf8   : > { %v3242_v24 = vld [vmem:[%s4329_s21 + $0x154] ss:$24 sps:$4 sm:$0xff]   ;;  %v3245_v27 = vld [vmem:[%s4329_s21 + $0x150] ss:$24 sps:$4 sm:$0xff]   ;;  %v3248_v28 = vld [vmem:[%s4329_s21 + $0x184] ss:$24 sps:$4 sm:$0xff]  }
  0xf9   : > { %1244 = vmatpush1.bf16.msra.mxu1 %v3250_v14  ;;  %v3270_v26 = vld [vmem:[%s4329_s21 + $0xfc] ss:$24 sps:$4 sm:$0xff]   ;;  %v3274_v29 = vld [vmem:[%s4329_s21 + $0xf8] ss:$24 sps:$4 sm:$0xff]   ;;  %v3276_v30 = vld [vmem:[%s4329_s21 + $0x12c] ss:$24 sps:$4 sm:$0xff]  }
  0xfa   : > { %1133 = vmatpush1.bf16.msra.mxu0 %v3227_v6  ;;  %1245 = vmatprep.subr.bf16.mxu1 %v3252_v15  ;;  %v3251_v31 = vld [vmem:[%s4329_s21 + $0x180] ss:$24 sps:$4 sm:$0xff]   ;;  %v3254_v32 = vld [vmem:[%s4329_s21 + $0x1b4] ss:$24 sps:$4 sm:$0xff]   ;;  %v3257_v36 = vld [vmem:[%s4329_s21 + $0x1b0] ss:$24 sps:$4 sm:$0xff]  }
  0xfb   : > { %1134 = vmatprep.subr.bf16.mxu0 %v3228_v7  ;;  %v3280_v33 = vld [vmem:[%s4329_s21 + $0x128] ss:$24 sps:$4 sm:$0xff]   ;;  %v3282_v34 = vld [vmem:[%s4329_s21 + $0x15c] ss:$24 sps:$4 sm:$0xff]   ;;  %v4386_v35 = vld [vmem:[%s4321_s27 + $0x4] ss:$8 sps:$4 sm:$0xff]  }
  0xfc   : > { %v3260_v37 = vld [vmem:[%s4329_s21 + $0x1e4] ss:$24 sps:$4 sm:$0xff]   ;;  %1160 = vmatprep.mubr.bf16.mxu0 %v4386_v35  ;;  %v3286_v38 = vld [vmem:[%s4329_s21 + $0x158] ss:$24 sps:$4 sm:$0xff]   ;;  %1273 = vmatprep.mubr.bf16.mxu1 %v4386_v35  ;;  %v3266_v41 = vld [vmem:[%s4329_s21 + $0x214] ss:$24 sps:$4 sm:$0xff]  }
  0xfd   : > { %1246 = vmatpush1.bf16.msra.mxu1 %v3256_v17  ;;  %v3288_v39 = vld [vmem:[%s4329_s21 + $0x18c] ss:$24 sps:$4 sm:$0xff]   ;;  %v3263_v40 = vld [vmem:[%s4329_s21 + $0x1e0] ss:$24 sps:$4 sm:$0xff]   ;;  %v3296_v43 = vld [vmem:[%s4329_s21 + $0x1bc] ss:$24 sps:$4 sm:$0xff]  }
  0xfe   : > { %1135 = vmatpush1.bf16.msra.mxu0 %v3230_v9  ;;  %1247 = vmatprep.subr.bf16.mxu1 %v3258_v18  ;;  %v3292_v42 = vld [vmem:[%s4329_s21 + $0x188] ss:$24 sps:$4 sm:$0xff]   ;;  %v3272_v45 = vld [vmem:[%s4329_s21 + $0x244] ss:$24 sps:$4 sm:$0xff]   ;;  %v3299_v46 = vld [vmem:[%s4329_s21 + $0x1b8] ss:$24 sps:$4 sm:$0xff]  }
  0xff   : > { %1136 = vmatprep.subr.bf16.mxu0 %v3231_v10  ;;  %v3269_v44 = vld [vmem:[%s4329_s21 + $0x210] ss:$24 sps:$4 sm:$0xff]   ;;  %v3303_v47 = vld [vmem:[%s4329_s21 + $0x1ec] ss:$24 sps:$4 sm:$0xff]   ;;  %v3275_v48 = vld [vmem:[%s4329_s21 + $0x240] ss:$24 sps:$4 sm:$0xff]  }
 0x100   : > { %v3278_v49 = vld [vmem:[%s4329_s21 + $0x274] ss:$24 sps:$4 sm:$0xff]   ;;  %v3305_v50 = vld [vmem:[%s4329_s21 + $0x1e8] ss:$24 sps:$4 sm:$0xff]   ;;  %v3284_v53 = vld [vmem:[%s4329_s21 + $0x2a4] ss:$24 sps:$4 sm:$0xff]  }
 0x101   : > { %1248 = vmatpush1.bf16.msra.mxu1 %v3262_v21  ;;  %v3311_v51 = vld [vmem:[%s4329_s21 + $0x21c] ss:$24 sps:$4 sm:$0xff]   ;;  %v3281_v52 = vld [vmem:[%s4329_s21 + $0x270] ss:$24 sps:$4 sm:$0xff]   ;;  %v3318_v55 = vld [vmem:[%s4329_s21 + $0x24c] ss:$24 sps:$4 sm:$0xff]  }
 0x102   : > { %1137 = vmatpush1.bf16.msra.mxu0 %v3233_v13  ;;  %1249 = vmatprep.subr.bf16.mxu1 %v3264_v22  ;;  %v3314_v54 = vld [vmem:[%s4329_s21 + $0x218] ss:$24 sps:$4 sm:$0xff]   ;;  %v3290_v57 = vld [vmem:[%s4329_s21 + $0x2d4] ss:$24 sps:$4 sm:$0xff]   ;;  %v3320_v58 = vld [vmem:[%s4329_s21 + $0x248] ss:$24 sps:$4 sm:$0xff]  }
 0x103   : > { %1138 = vmatprep.subr.bf16.mxu0 %v3234_v16  ;;  %v3287_v56 = vld [vmem:[%s4329_s21 + $0x2a0] ss:$24 sps:$4 sm:$0xff]   ;;  %v3326_v59 = vld [vmem:[%s4329_s21 + $0x27c] ss:$24 sps:$4 sm:$0xff]   ;;  %v3293_v60 = vld [vmem:[%s4329_s21 + $0x2d0] ss:$24 sps:$4 sm:$0xff]  }
 0x104   : > { %v3302_v61 = vld [vmem:[%s4329_s21 + $0x14] ss:$24 sps:$4 sm:$0xff]   ;;  %v3329_v62 = vld [vmem:[%s4329_s21 + $0x278] ss:$24 sps:$4 sm:$0xff]   ;;  %v4418_v63 = vld [vmem:[%s4321_s27] ss:$8 sps:$4 sm:$0xff]  }
 0x105   : > { %1250 = vmatpush1.bf16.msra.mxu1 %v3268_v25  ;;  %v3333_v0 = vld [vmem:[%s4329_s21 + $0x2ac] ss:$24 sps:$4 sm:$0xff]   ;;  %v3300_v1 = vld [vmem:[%s4329_s21 + $0x10] ss:$24 sps:$4 sm:$0xff]   ;;  %v4423_v2 = vld [vmem:[%s4321_s27 + $0x14] ss:$8 sps:$4 sm:$0xff]  }
 0x106   : > { %1139 = vmatpush1.bf16.msra.mxu0 %v3236_v19  ;;  %1251 = vmatprep.subr.bf16.mxu1 %v3270_v26  ;;  %v3308_v3 = vld [vmem:[%s4329_s21 + $0x44] ss:$24 sps:$4 sm:$0xff]   ;;  %v3335_v4 = vld [vmem:[%s4329_s21 + $0x2a8] ss:$24 sps:$4 sm:$0xff]   ;;  %v3317_v7 = vld [vmem:[%s4329_s21 + $0x74] ss:$24 sps:$4 sm:$0xff]  }
 0x107   : > { %1140 = vmatprep.subr.bf16.mxu0 %v3237_v20  ;;  %v3341_v5 = vld [vmem:[%s4329_s21 + $0x2dc] ss:$24 sps:$4 sm:$0xff]   ;;  %v3306_v6 = vld [vmem:[%s4329_s21 + $0x40] ss:$24 sps:$4 sm:$0xff]   ;;  %v3315_v10 = vld [vmem:[%s4329_s21 + $0x70] ss:$24 sps:$4 sm:$0xff]  }
 0x108   : > { %v3344_v8 = vld [vmem:[%s4329_s21 + $0x2d8] ss:$24 sps:$4 sm:$0xff]   ;;  %v4438_v11 = vld [vmem:[%s4321_s27 + $0x24] ss:$8 sps:$4 sm:$0xff]   ;;  %v4446_v15 = vld [vmem:[%s4321_s27 + $0x20] ss:$8 sps:$4 sm:$0xff]  }
 0x109   : > { %1252 = vmatpush1.bf16.msra.mxu1 %v3274_v29  ;;  %v4434_v9 = vld [vmem:[%s4321_s27 + $0x10] ss:$8 sps:$4 sm:$0xff]   ;;  %v3323_v12 = vld [vmem:[%s4329_s21 + $0xa4] ss:$24 sps:$4 sm:$0xff]   ;;  %v3332_v14 = vld [vmem:[%s4329_s21 + $0xd4] ss:$24 sps:$4 sm:$0xff]  }
 0x10a   : > { %1141 = vmatpush1.bf16.msra.mxu0 %v3239_v23  ;;  %1253 = vmatprep.subr.bf16.mxu1 %v3276_v30  ;;  %v3321_v13 = vld [vmem:[%s4329_s21 + $0xa0] ss:$24 sps:$4 sm:$0xff]   ;;  %v3330_v16 = vld [vmem:[%s4329_s21 + $0xd0] ss:$24 sps:$4 sm:$0xff]   ;;  %v4451_v17 = vld [vmem:[%s4321_s27 + $0x34] ss:$8 sps:$4 sm:$0xff]  }
 0x10b   : > { %1142 = vmatprep.subr.bf16.mxu0 %v3242_v24  ;;  %v3338_v18 = vld [vmem:[%s4329_s21 + $0x104] ss:$24 sps:$4 sm:$0xff]   ;;  %v3336_v19 = vld [vmem:[%s4329_s21 + $0x100] ss:$24 sps:$4 sm:$0xff]   ;;  %v3347_v20 = vld [vmem:[%s4329_s21 + $0x134] ss:$24 sps:$4 sm:$0xff]  }
 0x10c   : > { %v4460_v21 = vld [vmem:[%s4321_s27 + $0x30] ss:$8 sps:$4 sm:$0xff]   ;;  %v4465_v23 = vld [vmem:[%s4321_s27 + $0x44] ss:$8 sps:$4 sm:$0xff]   ;;  %v4480_v29 = vld [vmem:[%s4321_s27 + $0x54] ss:$8 sps:$4 sm:$0xff]  }
 0x10d   : > { %1254 = vmatpush1.bf16.msra.mxu1 %v3280_v33  ;;  %v3345_v22 = vld [vmem:[%s4329_s21 + $0x130] ss:$24 sps:$4 sm:$0xff]   ;;  %v3350_v24 = vld [vmem:[%s4329_s21 + $0x164] ss:$24 sps:$4 sm:$0xff]   ;;  %v3348_v25 = vld [vmem:[%s4329_s21 + $0x160] ss:$24 sps:$4 sm:$0xff]  }
 0x10e   : > { %1143 = vmatpush1.bf16.msra.mxu0 %v3245_v27  ;;  %1255 = vmatprep.subr.bf16.mxu1 %v3282_v34  ;;  %v3356_v26 = vld [vmem:[%s4329_s21 + $0x194] ss:$24 sps:$4 sm:$0xff]   ;;  %v4476_v27 = vld [vmem:[%s4321_s27 + $0x40] ss:$8 sps:$4 sm:$0xff]   ;;  %v3359_v30 = vld [vmem:[%s4329_s21 + $0x1c4] ss:$24 sps:$4 sm:$0xff]  }
 0x10f   : > { %1144 = vmatprep.subr.bf16.mxu0 %v3248_v28  ;;  %v3354_v28 = vld [vmem:[%s4329_s21 + $0x190] ss:$24 sps:$4 sm:$0xff]   ;;  %s5492_s29 = sld [smem:[#allocation19_spill]] }
 0x110   : > { %v4490_v33 = vld [vmem:[%s4321_s27 + $0x50] ss:$8 sps:$4 sm:$0xff]  }
 0x111   : > { %1256 = vmatpush1.bf16.msra.mxu1 %v3286_v38  ;;  %v3363_v34 = vld [vmem:[%s4329_s21 + $0x1f0] ss:$24 sps:$4 sm:$0xff]   ;;  %v3366_v38 = vld [vmem:[%s4329_s21 + $0x220] ss:$24 sps:$4 sm:$0xff]  }
 0x112   : > { %1145 = vmatpush1.bf16.msra.mxu0 %v3251_v31  ;;  %1257 = vmatprep.subr.bf16.mxu1 %v3288_v39  ;;  %v3357_v31 = vld [vmem:[%s4329_s21 + $0x1c0] ss:$24 sps:$4 sm:$0xff]   ;;  %v3374_v39 = vld [vmem:[%s4329_s21 + $0x254] ss:$24 sps:$4 sm:$0xff]  }
 0x113   : > { %1146 = vmatprep.subr.bf16.mxu0 %v3254_v32  ;;  %v3365_v32 = vld [vmem:[%s4329_s21 + $0x1f4] ss:$24 sps:$4 sm:$0xff]  }
 0x115   : > { %1258 = vmatpush1.bf16.msra.mxu1 %v3292_v42  ;;  %v4508_v42 = vld [vmem:[%s4321_s27 + $0x74] ss:$8 sps:$4 sm:$0xff]   ;;  %p2997_p12 = scmp.ne.s32.totalorder %s5492_s29, 1 }
 0x116   : > { %1147 = vmatpush1.bf16.msra.mxu0 %v3257_v36  ;;  %1259 = vmatprep.subr.bf16.mxu1 %v3296_v43  ;;  %v4494_v36 = vld [vmem:[%s4321_s27 + $0x64] ss:$8 sps:$4 sm:$0xff]  }
 0x117   : > { %1148 = vmatprep.subr.bf16.mxu0 %v3260_v37  ;;  %v3368_v37 = vld [vmem:[%s4329_s21 + $0x224] ss:$24 sps:$4 sm:$0xff]  }
 0x118   : > { %v3377_v43 = vld [vmem:[%s4329_s21 + $0x284] ss:$24 sps:$4 sm:$0xff]  }
 0x119   : > { %1260 = vmatpush1.bf16.msra.mxu1 %v3299_v46  ;;  %v4518_v46 = vld [vmem:[%s4321_s27 + $0x70] ss:$8 sps:$4 sm:$0xff]  }
 0x11a   : > { %1149 = vmatpush1.bf16.msra.mxu0 %v3263_v40  ;;  %1261 = vmatprep.subr.bf16.mxu1 %v3303_v47  ;;  %v4504_v40 = vld [vmem:[%s4321_s27 + $0x60] ss:$8 sps:$4 sm:$0xff]  }
 0x11b   : > { %1150 = vmatprep.subr.bf16.mxu0 %v3266_v41  ;;  %v3372_v41 = vld [vmem:[%s4329_s21 + $0x250] ss:$24 sps:$4 sm:$0xff]  }
 0x11c   : > { %v3381_v47 = vld [vmem:[%s4329_s21 + $0x2b0] ss:$24 sps:$4 sm:$0xff]  }
 0x11d   : > { %1262 = vmatpush1.bf16.msra.mxu1 %v3305_v50  ;;  %v3387_v50 = vld [vmem:[%s4337_s11] ss:$8 sps:$4 sm:$0xff]  }
 0x11e   : > { %1151 = vmatpush1.bf16.msra.mxu0 %v3269_v44  ;;  %1263 = vmatprep.subr.bf16.mxu1 %v3311_v51  ;;  %v3375_v44 = vld [vmem:[%s4329_s21 + $0x280] ss:$24 sps:$4 sm:$0xff]  }
 0x11f   : > { %1152 = vmatprep.subr.bf16.mxu0 %v3272_v45  ;;  %v3383_v45 = vld [vmem:[%s4329_s21 + $0x2b4] ss:$24 sps:$4 sm:$0xff]   ;;  %v3392_v51 = vld [vmem:[%s4337_s11 + $0x14] ss:$8 sps:$4 sm:$0xff]  }
 0x121   : > { %1264 = vmatpush1.bf16.msra.mxu1 %v3314_v54  ;;  %v3393_v54 = vld [vmem:[%s4337_s11 + $0x20] ss:$8 sps:$4 sm:$0xff]  }
 0x122   : > { %1153 = vmatpush1.bf16.msra.mxu0 %v3275_v48  ;;  %1265 = vmatprep.subr.bf16.mxu1 %v3318_v55  ;;  %v3386_v48 = vld [vmem:[%s4329_s21 + $0x2e4] ss:$24 sps:$4 sm:$0xff]   ;;  %v3398_v55 = vld [vmem:[%s4337_s11 + $0x34] ss:$8 sps:$4 sm:$0xff]  }
 0x123   : > { %1154 = vmatprep.subr.bf16.mxu0 %v3278_v49  ;;  %v3384_v49 = vld [vmem:[%s4329_s21 + $0x2e0] ss:$24 sps:$4 sm:$0xff]  }
 0x125   : > { %1266 = vmatpush1.bf16.msra.mxu1 %v3320_v58  ;;  %v3399_v58 = vld [vmem:[%s4337_s11 + $0x40] ss:$8 sps:$4 sm:$0xff]  }
 0x126   : > { %1155 = vmatpush1.bf16.msra.mxu0 %v3281_v52  ;;  %1267 = vmatprep.subr.bf16.mxu1 %v3326_v59  ;;  %v3390_v52 = vld [vmem:[%s4337_s11 + $0x10] ss:$8 sps:$4 sm:$0xff]   ;;  %v3404_v59 = vld [vmem:[%s4337_s11 + $0x54] ss:$8 sps:$4 sm:$0xff]  }
 0x127   : > { %1156 = vmatprep.subr.bf16.mxu0 %v3284_v53  ;;  %v3395_v53 = vld [vmem:[%s4337_s11 + $0x24] ss:$8 sps:$4 sm:$0xff]  }
 0x129   : > { %1268 = vmatpush1.bf16.msra.mxu1 %v3329_v62  ;;  %v3405_v62 = vld [vmem:[%s4337_s11 + $0x60] ss:$8 sps:$4 sm:$0xff]  }
 0x12a   : > { %1157 = vmatpush1.bf16.msra.mxu0 %v3287_v56  ;;  %1269 = vmatprep.subr.bf16.mxu1 %v3333_v0  ;;  %v3396_v56 = vld [vmem:[%s4337_s11 + $0x30] ss:$8 sps:$4 sm:$0xff]  }
 0x12b   : > { %1158 = vmatprep.subr.bf16.mxu0 %v3290_v57  ;;  %v3401_v57 = vld [vmem:[%s4337_s11 + $0x44] ss:$8 sps:$4 sm:$0xff]   ;;  %v3408_v0 = vld [vmem:[%s4337_s11 + $0x70] ss:$8 sps:$4 sm:$0xff]  }
 0x12d   : > { %1270 = vmatpush1.bf16.msra.mxu1 %v3335_v4  ;;  %v3414_v4 = vld [vmem:[%s4337_s11 + $0x90] ss:$8 sps:$4 sm:$0xff]  }
 0x12e   : > { %1159 = vmatpush1.bf16.msra.mxu0 %v3293_v60  ;;  %1271 = vmatprep.subr.bf16.mxu1 %v3341_v5  ;;  %v3402_v60 = vld [vmem:[%s4337_s11 + $0x50] ss:$8 sps:$4 sm:$0xff]   ;;  %v3419_v5 = vld [vmem:[%s4337_s11 + $0xa4] ss:$8 sps:$4 sm:$0xff]  }
 0x12f   : > { %1354 = vmatprep.subr.bf16.mxu0 %v3302_v61  ;;  %v3407_v61 = vld [vmem:[%s4337_s11 + $0x64] ss:$8 sps:$4 sm:$0xff]  }
 0x131   : > { %1161 = vmatmul.mubr.bf16.vlgmr.msra.gmra.mrb[0].mxu0 %v4418_v63  ;;  %1272 = vmatpush1.bf16.msra.mxu1 %v3344_v8  ;;  %v3420_v8 = vld [vmem:[%s4337_s11 + $0xb0] ss:$8 sps:$4 sm:$0xff]  }
 0x132   : > { %1355 = vmatpush1.bf16.msra.mxu0 %v3300_v1  ;;  %1170 = vmatprep.mubr.bf16.mxu0 %v4423_v2  ;;  %v3413_v1 = vld [vmem:[%s4337_s11 + $0x84] ss:$8 sps:$4 sm:$0xff]  }
 0x133   : > { %1356 = vmatprep.subr.bf16.mxu0 %v3308_v3  ;;  %v3416_v3 = vld [vmem:[%s4337_s11 + $0x94] ss:$8 sps:$4 sm:$0xff]  }
 0x134   : > { %1274 = vmatmul.mubr.bf16.vlgmr.msra.gmra.mrb[0].mxu1 %v4418_v63 }
 0x135   : > { %1283 = vmatprep.mubr.bf16.mxu1 %v4423_v2 }
 0x136   : > { %1357 = vmatpush1.bf16.msra.mxu0 %v3306_v6  ;;  %v3417_v6 = vld [vmem:[%s4337_s11 + $0xa0] ss:$8 sps:$4 sm:$0xff]  }
 0x137   : > { %1358 = vmatprep.subr.bf16.mxu0 %v3317_v7  ;;  %v3422_v7 = vld [vmem:[%s4337_s11 + $0xb4] ss:$8 sps:$4 sm:$0xff]  }
 0x139   : > { %1171 = vmatmul.mubr.bf16.gmra.mrb[4].mxu0 %v4434_v9 }
 0x13a   : > { %1359 = vmatpush1.bf16.msra.mxu0 %v3315_v10  ;;  %1180 = vmatprep.mubr.bf16.mxu0 %v4438_v11  ;;  %v3423_v10 = vld [vmem:[%s4337_s11 + $0xc0] ss:$8 sps:$4 sm:$0xff]  }
 0x13b   : > { %1360 = vmatprep.subr.bf16.mxu0 %v3323_v12  ;;  %v3426_v12 = vld [vmem:[%s4337_s11 + $0xd0] ss:$8 sps:$4 sm:$0xff]  }
 0x13c   : > { %1284 = vmatmul.mubr.bf16.gmra.mrb[4].mxu1 %v4434_v9 }
 0x13d   : > { %1293 = vmatprep.mubr.bf16.mxu1 %v4438_v11 }
 0x13e   : > { %1361 = vmatpush1.bf16.msra.mxu0 %v3321_v13  ;;  %v3431_v13 = vld [vmem:[%s4337_s11 + $0xe4] ss:$8 sps:$4 sm:$0xff]  }
 0x13f   : > { %1362 = vmatprep.subr.bf16.mxu0 %v3332_v14  ;;  %v3429_v14 = vld [vmem:[%s4337_s11 + $0xe0] ss:$8 sps:$4 sm:$0xff]  }
 0x141   : > { %1181 = vmatmul.mubr.bf16.gmra.mrb[8].mxu0 %v4446_v15 }
 0x142   : > { %1363 = vmatpush1.bf16.msra.mxu0 %v3330_v16  ;;  %1190 = vmatprep.mubr.bf16.mxu0 %v4451_v17  ;;  %v3432_v16 = vld [vmem:[%s4337_s11 + $0xf0] ss:$8 sps:$4 sm:$0xff]  }
 0x143   : > { %1364 = vmatprep.subr.bf16.mxu0 %v3338_v18 }
 0x144   : > { %1294 = vmatmul.mubr.bf16.gmra.mrb[8].mxu1 %v4446_v15 }
 0x145   : > { %1303 = vmatprep.mubr.bf16.mxu1 %v4451_v17 }
 0x146   : > { %1365 = vmatpush1.bf16.msra.mxu0 %v3336_v19 }
 0x147   : > { %1366 = vmatprep.subr.bf16.mxu0 %v3347_v20  ;;  %v4579_v20 = vld [vmem:[%s4335_s12] sm:$0x3f] }
 0x149   : > { %1191 = vmatmul.mubr.bf16.gmra.mrb[12].mxu0 %v4460_v21 }
 0x14a   : > { %1367 = vmatpush1.bf16.msra.mxu0 %v3345_v22  ;;  %1200 = vmatprep.mubr.bf16.mxu0 %v4465_v23  ;;  %v3437_v22 = vld [vmem:[%s4337_s11 + $0x104] ss:$8 sps:$4 sm:$0xff]  }
 0x14b   : > { %1368 = vmatprep.subr.bf16.mxu0 %v3350_v24 }
 0x14c   : > { %1304 = vmatmul.mubr.bf16.gmra.mrb[12].mxu1 %v4460_v21 }
 0x14d   : > { %1313 = vmatprep.mubr.bf16.mxu1 %v4465_v23 }
 0x14e   : > { %1369 = vmatpush1.bf16.msra.mxu0 %v3348_v25 }
 0x14f   : > { %1370 = vmatprep.subr.bf16.mxu0 %v3356_v26 }
 0x151   : > { %1201 = vmatmul.mubr.bf16.gmra.mrb[16].mxu0 %v4476_v27 }
 0x152   : > { %1371 = vmatpush1.bf16.msra.mxu0 %v3354_v28  ;;  %1210 = vmatprep.mubr.bf16.mxu0 %v4480_v29 }
 0x153   : > { %1372 = vmatprep.subr.bf16.mxu0 %v3359_v30 }
 0x154   : > { %1314 = vmatmul.mubr.bf16.gmra.mrb[16].mxu1 %v4476_v27 }
 0x155   : > { %1323 = vmatprep.mubr.bf16.mxu1 %v4480_v29 }
 0x156   : > { %1373 = vmatpush1.bf16.msra.mxu0 %v3357_v31 }
 0x157   : > { %1374 = vmatprep.subr.bf16.mxu0 %v3365_v32 }
 0x159   : > { %1211 = vmatmul.mubr.bf16.gmra.mrb[20].mxu0 %v4490_v33 }
 0x15a   : > { %1375 = vmatpush1.bf16.msra.mxu0 %v3363_v34  ;;  %1220 = vmatprep.mubr.bf16.mxu0 %v4494_v36 }
 0x15b   : > { %1376 = vmatprep.subr.bf16.mxu0 %v3368_v37 }
 0x15c   : > { %1324 = vmatmul.mubr.bf16.gmra.mrb[20].mxu1 %v4490_v33 }
 0x15d   : > { %1333 = vmatprep.mubr.bf16.mxu1 %v4494_v36 }
 0x15e   : > { %1377 = vmatpush1.bf16.msra.mxu0 %v3366_v38 }
 0x15f   : > { %1378 = vmatprep.subr.bf16.mxu0 %v3374_v39 }
 0x161   : > { %1221 = vmatmul.mubr.bf16.gmra.mrb[24].mxu0 %v4504_v40 }
 0x162   : > { %1379 = vmatpush1.bf16.msra.mxu0 %v3372_v41  ;;  %1230 = vmatprep.mubr.bf16.mxu0 %v4508_v42 }
 0x163   : > { %1380 = vmatprep.subr.bf16.mxu0 %v3377_v43 }
 0x164   : > { %1334 = vmatmul.mubr.bf16.gmra.mrb[24].mxu1 %v4504_v40 }
 0x165   : > { %1343 = vmatprep.mubr.bf16.mxu1 %v4508_v42 }
 0x166   : > { %1381 = vmatpush1.bf16.msra.mxu0 %v3375_v44 }
 0x167   : > { %1382 = vmatprep.subr.bf16.mxu0 %v3383_v45 }
 0x169   : > { %1231 = vmatmul.mubr.bf16.gmra.mrb[28].mxu0 %v4518_v46 }
 0x16a   : > { %1383 = vmatpush1.bf16.msra.mxu0 %v3381_v47  ;;  %1386 = vmatprep.mubr.bf16.mxu0 %v4386_v35  ;;  %v3389_v35 = vld [vmem:[%s4337_s11 + $0x4] ss:$8 sps:$4 sm:$0xff]  }
 0x16b   : > { %1384 = vmatprep.subr.bf16.mxu0 %v3386_v48  ;;  %3011 = vmatprep.subr.bf16.mxu1 %v3389_v35 }
 0x16c   : > { %1344 = vmatmul.mubr.bf16.gmra.mrb[28].mxu1 %v4518_v46 }
 0x16d   : > { %3027 = vmatpush1.bf16.msra.mxu1 %v3387_v50 }
 0x16e   : > { %1385 = vmatpush1.bf16.msra.mxu0 %v3384_v49  ;;  %3012 = vmatprep.subr.bf16.mxu1 %v3392_v51 }
 0x16f   : > { %2195 = vmatprep.subr.bf16.mxu0 %v3389_v35 }
 0x171   : > { %1387 = vmatmul.mubr.bf16.vlgmr.msra.gmra.mrb[32].mxu0 %v4418_v63  ;;  %3028 = vmatpush1.bf16.msra.mxu1 %v3390_v52  ;;  %v3410_v63 = vld [vmem:[%s4337_s11 + $0x74] ss:$8 sps:$4 sm:$0xff]  }
 0x172   : > { %1396 = vmatprep.mubr.bf16.mxu0 %v4423_v2  ;;  %2196 = vmatpush1.bf16.msra.mxu0 %v3387_v50  ;;  %v3411_v2 = vld [vmem:[%s4337_s11 + $0x80] ss:$8 sps:$4 sm:$0xff]  }
 0x173   : > { %2197 = vmatprep.subr.bf16.mxu0 %v3392_v51  ;;  %3013 = vmatprep.subr.bf16.mxu1 %v3395_v53 }
 0x175   : > { %3029 = vmatpush1.bf16.msra.mxu1 %v3393_v54 }
 0x176   : > { %2198 = vmatpush1.bf16.msra.mxu0 %v3390_v52  ;;  %3014 = vmatprep.subr.bf16.mxu1 %v3398_v55 }
 0x177   : > { %2199 = vmatprep.subr.bf16.mxu0 %v3395_v53 }
 0x179   : > { %1397 = vmatmul.mubr.bf16.gmra.mrb[36].mxu0 %v4434_v9  ;;  %3030 = vmatpush1.bf16.msra.mxu1 %v3396_v56  ;;  %v3425_v9 = vld [vmem:[%s4337_s11 + $0xc4] ss:$8 sps:$4 sm:$0xff]  }
 0x17a   : > { %1406 = vmatprep.mubr.bf16.mxu0 %v4438_v11  ;;  %2200 = vmatpush1.bf16.msra.mxu0 %v3393_v54  ;;  %v3428_v11 = vld [vmem:[%s4337_s11 + $0xd4] ss:$8 sps:$4 sm:$0xff]  }
 0x17b   : > { %2201 = vmatprep.subr.bf16.mxu0 %v3398_v55  ;;  %3015 = vmatprep.subr.bf16.mxu1 %v3401_v57 }
 0x17d   : > { %3031 = vmatpush1.bf16.msra.mxu1 %v3399_v58 }
 0x17e   : > { %2202 = vmatpush1.bf16.msra.mxu0 %v3396_v56  ;;  %3016 = vmatprep.subr.bf16.mxu1 %v3404_v59 }
 0x17f   : > { %2203 = vmatprep.subr.bf16.mxu0 %v3401_v57 }
 0x181   : > { %1407 = vmatmul.mubr.bf16.gmra.mrb[40].mxu0 %v4446_v15  ;;  %3032 = vmatpush1.bf16.msra.mxu1 %v3402_v60  ;;  %v3434_v15 = vld [vmem:[%s4337_s11 + $0xf4] ss:$8 sps:$4 sm:$0xff]  }
 0x182   : > { %1416 = vmatprep.mubr.bf16.mxu0 %v4451_v17  ;;  %2204 = vmatpush1.bf16.msra.mxu0 %v3399_v58  ;;  %v538_v17 = vlaneseq }
 0x183   : > { %2205 = vmatprep.subr.bf16.mxu0 %v3404_v59  ;;  %3017 = vmatprep.subr.bf16.mxu1 %v3407_v61 }
 0x184   : > { %v4575_v18 = vshrl.u32 %v538_v17, 7 }
 0x185   : > { %3033 = vmatpush1.bf16.msra.mxu1 %v3405_v62 }
 0x186   : > { %2206 = vmatpush1.bf16.msra.mxu0 %v3402_v60  ;;  %3018 = vmatprep.subr.bf16.mxu1 %v3410_v63  ;;  %5445 = vst [vmem:[#allocation27_spill] sm:$0xff] %v4575_v18  ;;  %v5380_v19 = vsub.s32 0, %v4575_v18 }
 0x187   : > { %2207 = vmatprep.subr.bf16.mxu0 %v3407_v61 }
 0x189   : > { %1417 = vmatmul.mubr.bf16.gmra.mrb[44].mxu0 %v4460_v21  ;;  %3034 = vmatpush1.bf16.msra.mxu1 %v3408_v0  ;;  %v5379_v21 = vsub.s32 1, %v4575_v18 }
 0x18a   : > { %1426 = vmatprep.mubr.bf16.mxu0 %v4465_v23  ;;  %2208 = vmatpush1.bf16.msra.mxu0 %v3405_v62  ;;  %v4586_v23 = vrot.slane %v4579_v20, %v5380_v19 }
 0x18b   : > { %2209 = vmatprep.subr.bf16.mxu0 %v3410_v63  ;;  %3019 = vmatprep.subr.bf16.mxu1 %v3413_v1  ;;  %v4591_v24 = vrot.slane %v4579_v20, %v5379_v21 }
 0x18d   : > { %3035 = vmatpush1.bf16.msra.mxu1 %v3411_v2 }
 0x18e   : > { %2210 = vmatpush1.bf16.msra.mxu0 %v3408_v0  ;;  %3020 = vmatprep.subr.bf16.mxu1 %v3416_v3 }
 0x18f   : > { %2211 = vmatprep.subr.bf16.mxu0 %v3413_v1 }
 0x191   : > { %1427 = vmatmul.mubr.bf16.gmra.mrb[48].mxu0 %v4476_v27  ;;  %3036 = vmatpush1.bf16.msra.mxu1 %v3414_v4 }
 0x192   : > { %1436 = vmatprep.mubr.bf16.mxu0 %v4480_v29  ;;  %2212 = vmatpush1.bf16.msra.mxu0 %v3411_v2 }
 0x193   : > { %2213 = vmatprep.subr.bf16.mxu0 %v3416_v3  ;;  %3021 = vmatprep.subr.bf16.mxu1 %v3419_v5 }
 0x195   : > { %3037 = vmatpush1.bf16.msra.mxu1 %v3417_v6 }
 0x196   : > { %2214 = vmatpush1.bf16.msra.mxu0 %v3414_v4  ;;  %3022 = vmatprep.subr.bf16.mxu1 %v3422_v7 }
 0x197   : > { %2215 = vmatprep.subr.bf16.mxu0 %v3419_v5 }
 0x199   : > { %1437 = vmatmul.mubr.bf16.gmra.mrb[52].mxu0 %v4490_v33  ;;  %3038 = vmatpush1.bf16.msra.mxu1 %v3420_v8  ;;  %v548_v33 = vsub.s32 2, %v4575_v18 }
 0x19a   : > { %1446 = vmatprep.mubr.bf16.mxu0 %v4494_v36  ;;  %2216 = vmatpush1.bf16.msra.mxu0 %v3417_v6 }
 0x19b   : > { %2217 = vmatprep.subr.bf16.mxu0 %v3422_v7  ;;  %3023 = vmatprep.subr.bf16.mxu1 %v3425_v9  ;;  %v4611_v39 = vrot.slane %v4579_v20, %v548_v33 }
 0x19d   : > { %3039 = vmatpush1.bf16.msra.mxu1 %v3423_v10 }
 0x19e   : > { %2218 = vmatpush1.bf16.msra.mxu0 %v3420_v8  ;;  %3024 = vmatprep.subr.bf16.mxu1 %v3428_v11 }
 0x19f   : > { %2219 = vmatprep.subr.bf16.mxu0 %v3425_v9  ;;  %v552_v9 = vsub.s32 3, %v4575_v18 }
 0x1a1   : > { %1447 = vmatmul.mubr.bf16.gmra.mrb[56].mxu0 %v4504_v40  ;;  %3040 = vmatpush1.bf16.msra.mxu1 %v3426_v12 }
 0x1a2   : > { %1456 = vmatprep.mubr.bf16.mxu0 %v4508_v42  ;;  %2220 = vmatpush1.bf16.msra.mxu0 %v3423_v10 }
 0x1a3   : > { %2221 = vmatprep.subr.bf16.mxu0 %v3428_v11  ;;  %3025 = vmatprep.subr.bf16.mxu1 %v3431_v13 }
 0x1a5   : > { %3041 = vmatpush1.bf16.msra.mxu1 %v3429_v14 }
 0x1a6   : > { %2222 = vmatpush1.bf16.msra.mxu0 %v3426_v12  ;;  %3026 = vmatprep.subr.bf16.mxu1 %v3434_v15 }
 0x1a7   : > { %2223 = vmatprep.subr.bf16.mxu0 %v3431_v13 }
 0x1a9   : > { %1457 = vmatmul.mubr.bf16.gmra.mrb[60].mxu0 %v4518_v46  ;;  %3042 = vmatpush1.bf16.msra.mxu1 %v3432_v16 }
 0x1aa   : > { %2224 = vmatpush1.bf16.msra.mxu0 %v3429_v14  ;;  %2308 = vmatprep.subr.bf16.mxu1 %v3437_v22 }
 0x1ab   : > { %2225 = vmatprep.subr.bf16.mxu0 %v3434_v15 }
 0x1ae   : > { %2226 = vmatpush1.bf16.msra.mxu0 %v3432_v16 }
 0x204   : > { %v1162_v25 = vpop.f32.mrb[0].mxu0 }
 0x205   : > { %v4594_v26 = vadd.f32 %v1162_v25, %v4586_v23  ;;  %v1164_v27 = vpop.f32.mrb[1].mxu0  ;;  %v4665_v25 = vrot.slane %v4579_v20, %v552_v9 }
 0x206   : > { %v4597_v28 = vadd.f32 %v1164_v27, %v4591_v24  ;;  %v1166_v29 = vpop.f32.mrb[2].mxu0 }
 0x207   : > { %v2901_v30 = vmul.f32 -1.442695, %v4594_v26  ;;  %v4601_v31 = vadd.f32 %v1166_v29, %v4586_v23  ;;  %v1168_v32 = vpop.f32.mrb[3].mxu0  ;;  %v1275_v45 = vpop.f32.mrb[0].mxu1 }
 0x208   : > { %v2902_v34 = vmul.f32 -1.442695, %v4597_v28  ;;  %v4606_v36 = vadd.f32 %v1168_v32, %v4591_v24  ;;  %v4624_v49 = vadd.f32 %v1275_v45, %v4611_v39  ;;  %v4626_v35 = vpop.f32.mrb[1].mxu1 }
 0x209   : > { %3459 = vpow2.f32 %v2901_v30  ;;  %v2904_v37 = vmul.f32 -1.442695, %v4601_v31  ;;  %v4632_v52 = vpop.f32.mrb[2].mxu1 }
 0x20a   : > { %3461 = vpow2.f32 %v2902_v34  ;;  %v2905_v38 = vmul.f32 -1.442695, %v4606_v36  ;;  %v4635_v54 = vpop.f32.mrb[3].mxu1  ;;  %v2903_v57 = vmul.f32 -1.442695, %v4624_v49 }
 0x20b   : > { %3463 = vpow2.f32 %v2904_v37 }
 0x20c   : > { %3465 = vpow2.f32 %v2905_v38  ;;  %v1172_v40 = vpop.f32.mrb[4].mxu0 }
 0x20d   : > { %v4614_v41 = vadd.f32 %v1172_v40, %v4586_v23  ;;  %v1174_v42 = vpop.f32.mrb[5].mxu0 }
 0x20e   : > { %v4617_v43 = vadd.f32 %v1174_v42, %v4591_v24  ;;  %v1176_v44 = vpop.f32.mrb[6].mxu0 }
 0x20f   : > { %v2907_v46 = vmul.f32 -1.442695, %v4614_v41  ;;  %v4621_v47 = vadd.f32 %v1176_v44, %v4586_v23  ;;  %v1178_v48 = vpop.f32.mrb[7].mxu0  ;;  %v4645_v5 = vpop.f32.mrb[4].mxu1 }
 0x210   : > { %v2908_v50 = vmul.f32 -1.442695, %v4617_v43  ;;  %v4630_v51 = vadd.f32 %v1178_v48, %v4591_v24  ;;  %v4652_v10 = vpop.f32.mrb[5].mxu1 }
 0x211   : > { %3467 = vpow2.f32 %v2907_v46  ;;  %v2910_v53 = vmul.f32 -1.442695, %v4621_v47  ;;  %v4658_v13 = vpop.f32.mrb[6].mxu1 }
 0x212   : > { %3469 = vpow2.f32 %v2908_v50  ;;  %v2911_v55 = vmul.f32 -1.442695, %v4630_v51  ;;  %v4661_v16 = vpop.f32.mrb[7].mxu1 }
 0x213   : > { %v3460_v56 = vpop.eup %3459  ;;  %3471 = vpow2.f32 %v2910_v53  ;;  %v1278_v53 = vadd.f32 %v4626_v35, %v4665_v25 }
 0x214   : > { %v3462_v58 = vpop.eup %3461  ;;  %v1611_v59 = vadd.f32 1.0, %v3460_v56  ;;  %3473 = vpow2.f32 %v2911_v55  ;;  %v1182_v60 = vpop.f32.mrb[8].mxu0 }
 0x215   : > { %v3464_v61 = vpop.eup %3463  ;;  %v1612_v62 = vadd.f32 1.0, %v3462_v58  ;;  %v4640_v63 = vadd.f32 %v1182_v60, %v4586_v23  ;;  %v1184_v0 = vpop.f32.mrb[9].mxu0 }
 0x216   : > { %v3466_v1 = vpop.eup %3465  ;;  %3475 = vrcp.f32 %v1611_v59  ;;  %v1614_v2 = vadd.f32 1.0, %v3464_v61  ;;  %v4643_v3 = vadd.f32 %v1184_v0, %v4591_v24  ;;  %v1186_v4 = vpop.f32.mrb[10].mxu0  ;;  %v1282_v59 = vadd.f32 %v4635_v54, %v4665_v25 }
 0x217   : > { %v2913_v6 = vmul.f32 -1.442695, %v4640_v63  ;;  %v4649_v7 = vadd.f32 %v1186_v4, %v4586_v23  ;;  %v1188_v8 = vpop.f32.mrb[11].mxu0  ;;  %3477 = vpow2.f32 %v2903_v57  ;;  %v1615_v14 = vadd.f32 1.0, %v3466_v1  ;;  %v4673_v45 = vpop.f32.mrb[8].mxu1 }
 0x218   : > { %3479 = vrcp.f32 %v1614_v2  ;;  %v2914_v11 = vmul.f32 -1.442695, %v4643_v3  ;;  %v4656_v12 = vadd.f32 %v1188_v8, %v4591_v24  ;;  %v4681_v55 = vpop.f32.mrb[9].mxu1 }
 0x219   : > { %3481 = vrcp.f32 %v1612_v62  ;;  %v2916_v15 = vmul.f32 -1.442695, %v4649_v7  ;;  %v4689_v60 = vpop.f32.mrb[10].mxu1 }
 0x21a   : > { %3483 = vpow2.f32 %v2913_v6  ;;  %v2917_v22 = vmul.f32 -1.442695, %v4656_v12  ;;  %v4693_v1 = vpop.f32.mrb[11].mxu1  ;;  %v4698_v6 = vadd.f32 %v4632_v52, %v4611_v39 }
 0x21b   : > { %v3468_v17 = vpop.eup %3467  ;;  %3485 = vpow2.f32 %v2914_v11 }
 0x21c   : > { %v3470_v27 = vpop.eup %3469  ;;  %v1617_v29 = vadd.f32 1.0, %v3468_v17  ;;  %3487 = vpow2.f32 %v2916_v15  ;;  %v1192_v30 = vpop.f32.mrb[12].mxu0  ;;  %v556_v15 = vsub.s32 4, %v4575_v18 }
 0x21d   : > { %v3472_v32 = vpop.eup %3471  ;;  %3489 = vrcp.f32 %v1615_v14  ;;  %v1618_v33 = vadd.f32 1.0, %v3470_v27  ;;  %v4668_v34 = vadd.f32 %v1192_v30, %v4586_v23  ;;  %v1194_v37 = vpop.f32.mrb[13].mxu0 }
 0x21e   : > { %v3474_v38 = vpop.eup %3473  ;;  %3491 = vrcp.f32 %v1617_v29  ;;  %v1620_v40 = vadd.f32 1.0, %v3472_v32  ;;  %v4671_v42 = vadd.f32 %v1194_v37, %v4591_v24  ;;  %v1196_v44 = vpop.f32.mrb[14].mxu0  ;;  %v2906_v32 = vmul.f32 -1.442695, %v4698_v6 }
 0x21f   : > { %3493 = vpow2.f32 %v2917_v22  ;;  %v2919_v46 = vmul.f32 -1.442695, %v4668_v34  ;;  %v4677_v48 = vadd.f32 %v1196_v44, %v4586_v23  ;;  %v1198_v50 = vpop.f32.mrb[15].mxu0  ;;  %v1621_v0 = vadd.f32 1.0, %v3474_v38  ;;  %v4715_v38 = vpop.f32.mrb[12].mxu1 }
 0x220   : > { %v3476_v56 = vpop.eup %3475  ;;  %3495 = vrcp.f32 %v1620_v40  ;;  %v2920_v57 = vmul.f32 -1.442695, %v4671_v42  ;;  %v4685_v58 = vadd.f32 %v1198_v50, %v4591_v24 }
 0x221   : > { %v3478_v61 = vpop.eup %3477  ;;  %v1755_v62 = vmul.f32 %v3476_v56, %v4594_v26  ;;  %3497 = vrcp.f32 %v1618_v33  ;;  %v2922_v35 = vmul.f32 -1.442695, %v4677_v48  ;;  %v4723_v56 = vpop.f32.mrb[13].mxu1 }
 0x222   : > { %5446 = vst [vmem:[#allocation28_spill] sm:$0xff] %v4685_v58  ;;  %v3480_v2 = vpop.eup %3479  ;;  %3499 = vpow2.f32 %v2919_v46  ;;  %v2923_v4 = vmul.f32 -1.442695, %v4685_v58  ;;  %v1613_v11 = vadd.f32 1.0, %v3478_v61 }
 0x223   : > { %v4700_v54 = vpop.eup %3481  ;;  %v1758_v8 = vmul.f32 %v3480_v2, %v4601_v31  ;;  %3501 = vpow2.f32 %v2920_v57  ;;  %v4703_v26 = vmul.f32 %v1755_v62, %v1278_v53  ;;  %v1288_v53 = vadd.f32 %v4652_v10, %v4665_v25  ;;  %v4729_v62 = vpop.f32.mrb[14].mxu1 }
 0x224   : > { %v3484_v9 = vpop.eup %3483  ;;  %3503 = vpow2.f32 %v2922_v35  ;;  %v1202_v14 = vpop.f32.mrb[16].mxu0  ;;  %v1292_v10 = vadd.f32 %v4661_v16, %v4665_v25 }
 0x225   : > { %v3486_v17 = vpop.eup %3485  ;;  %3505 = vrcp.f32 %v1621_v0  ;;  %v1623_v22 = vadd.f32 1.0, %v3484_v9  ;;  %v4706_v27 = vmul.f32 %v1758_v8, %v1282_v59  ;;  %v4709_v52 = vadd.f32 %v1202_v14, %v4586_v23  ;;  %v1204_v29 = vpop.f32.mrb[17].mxu0 }
 0x226   : > { %v3488_v30 = vpop.eup %3487  ;;  %v1624_v31 = vadd.f32 1.0, %v3486_v17  ;;  %3507 = vpow2.f32 %v2923_v4  ;;  %v4713_v33 = vadd.f32 %v1204_v29, %v4591_v24  ;;  %v1206_v37 = vpop.f32.mrb[18].mxu0  ;;  %v560_v14 = vsub.s32 5, %v4575_v18 }
 0x227   : > { %v4717_v40 = vpop.eup %3489  ;;  %3509 = vrcp.f32 %v1623_v22  ;;  %v1626_v44 = vadd.f32 1.0, %v3488_v30  ;;  %v1208_v50 = vpop.f32.mrb[19].mxu0  ;;  %v2925_v59 = vmul.f32 -1.442695, %v4709_v52  ;;  %v4727_v61 = vadd.f32 %v1206_v37, %v4586_v23 }
 0x228   : > { %5447 = vst [vmem:[#allocation29_spill] sm:$0xff] %v4713_v33  ;;  %v3492_v57 = vpop.eup %3491  ;;  %3511 = vrcp.f32 %v1613_v11  ;;  %v2926_v2 = vmul.f32 -1.442695, %v4713_v33  ;;  %v4735_v4 = vpop.f32.mrb[15].mxu1  ;;  %v4739_v11 = vrot.slane %v4579_v20, %v556_v15  ;;  %v4744_v22 = vadd.f32 %v1208_v50, %v4591_v24 }
 0x229   : > { %v3494_v0 = vpop.eup %3493  ;;  %v1761_v35 = vmul.f32 %v3492_v57, %v4614_v41  ;;  %3513 = vrcp.f32 %v1626_v44  ;;  %v2928_v9 = vmul.f32 -1.442695, %v4727_v61  ;;  %v4754_v15 = vadd.f32 %v4658_v13, %v4611_v39  ;;  %v4765_v13 = vpop.f32.mrb[16].mxu1 }
 0x22a   : > { %v3496_v8 = vpop.eup %3495  ;;  %3515 = vrcp.f32 %v1624_v31  ;;  %5448 = vst [vmem:[#allocation30_spill] sm:$0xff] %v4744_v22  ;;  %v1627_v30 = vadd.f32 1.0, %v3494_v0  ;;  %v4750_v31 = vadd.f32 %v4645_v5, %v4611_v39  ;;  %v4806_v18 = vadd.f32 %v4715_v38, %v4611_v39 }
 0x22b   : > { %v3498_v17 = vpop.eup %3497  ;;  %v1764_v41 = vmul.f32 %v3496_v8, %v4621_v47  ;;  %3517 = vpow2.f32 %v2906_v32  ;;  %v4746_v29 = vmul.f32 %v1761_v35, %v1288_v53  ;;  %v4760_v53 = vadd.f32 %v4673_v45, %v4611_v39 }
 0x22c   : > { %v3500_v16 = vpop.eup %3499  ;;  %3519 = vpow2.f32 %v2925_v59  ;;  %v1212_v37 = vpop.f32.mrb[20].mxu0  ;;  %v4768_v35 = vrot.slane %v4579_v20, %v560_v14  ;;  %v2929_v8 = vmul.f32 -1.442695, %v4744_v22  ;;  %v1298_v20 = vadd.f32 %v4681_v55, %v4665_v25  ;;  %5452 = vst [vmem:[#allocation34_spill] sm:$0xff] %v4806_v18 }
 0x22d   : > { %v3502_v44 = vpop.eup %3501  ;;  %v1629_v47 = vadd.f32 1.0, %v3500_v16  ;;  %3521 = vpow2.f32 %v2926_v2  ;;  %v4756_v32 = vmul.f32 %v1764_v41, %v1292_v10  ;;  %v1214_v50 = vpop.f32.mrb[21].mxu0  ;;  %5449 = vst [vmem:[#allocation31_spill] sm:$0xff] %v4760_v53  ;;  %v4763_v5 = vadd.f32 %v1212_v37, %v4586_v23 }
 0x22e   : > { %v3504_v57 = vpop.eup %3503  ;;  %v1630_v59 = vadd.f32 1.0, %v3502_v44  ;;  %3523 = vpow2.f32 %v2928_v9  ;;  %v1216_v0 = vpop.f32.mrb[22].mxu0  ;;  %v4772_v45 = vadd.f32 %v1214_v50, %v4591_v24  ;;  %v2909_v37 = vmul.f32 -1.442695, %v4750_v31 }
 0x22f   : > { %v3506_v2 = vpop.eup %3505  ;;  %3525 = vrcp.f32 %v1629_v47  ;;  %v1632_v10 = vadd.f32 1.0, %v3504_v57  ;;  %v1218_v41 = vpop.f32.mrb[23].mxu0  ;;  %v2912_v44 = vmul.f32 -1.442695, %v4754_v15  ;;  %v4784_v57 = vmul.f32 %v4700_v54, %v4597_v28 }
 0x230   : > { %5450 = vst [vmem:[#allocation32_spill] sm:$0xff] %v4772_v45  ;;  %v4774_v16 = vpop.f32.mrb[17].mxu1  ;;  %v3508_v9 = vpop.eup %3507  ;;  %3527 = vrcp.f32 %v1627_v30  ;;  %v4787_v50 = vmul.f32 -1.442695, %v4760_v53  ;;  %v4791_v30 = vadd.f32 %v4689_v60, %v4611_v39  ;;  %v2931_v46 = vmul.f32 -1.442695, %v4763_v5 }
 0x231   : > { %v4780_v14 = vpop.f32.mrb[18].mxu1  ;;  %v3510_v47 = vpop.eup %3509  ;;  %3529 = vrcp.f32 %v1632_v10  ;;  %v1302_v28 = vadd.f32 %v4693_v1, %v4665_v25  ;;  %v4801_v10 = vmul.f32 %v4717_v40, %v4606_v36  ;;  %v2932_v60 = vmul.f32 -1.442695, %v4772_v45 }
 0x232   : > { %5451 = vst [vmem:[#allocation33_spill] sm:$0xff] %v4791_v30  ;;  %v4793_v21 = vpop.f32.mrb[19].mxu1  ;;  %v3512_v19 = vpop.eup %3511  ;;  %v1767_v55 = vmul.f32 %v3510_v47, %v4640_v63  ;;  %3531 = vrcp.f32 %v1630_v59  ;;  %v4810_v59 = vadd.f32 %v1216_v0, %v4586_v23  ;;  %v4815_v36 = vmul.f32 %v3498_v17, %v4617_v43 }
 0x233   : > { %v3514_v54 = vpop.eup %3513  ;;  %3533 = vpow2.f32 %v2929_v8  ;;  %v2918_v40 = vmul.f32 -1.442695, %v4791_v30  ;;  %v4820_v38 = vadd.f32 %v4729_v62, %v4611_v39  ;;  %v4825_v43 = vadd.f32 %v1218_v41, %v4591_v24 }
 0x234   : > { %v3516_v22 = vpop.eup %3515  ;;  %v1770_v63 = vmul.f32 %v3514_v54, %v4649_v7  ;;  %3535 = vpow2.f32 %v2909_v37  ;;  %v4812_v1 = vmul.f32 %v1767_v55, %v1298_v20  ;;  %v1222_v47 = vpop.f32.mrb[24].mxu0  ;;  %v1633_v37 = vadd.f32 1.0, %v3508_v9 }
 0x235   : > { %v3518_v33 = vpop.eup %3517  ;;  %3537 = vpow2.f32 %v2912_v44  ;;  %v1224_v8 = vpop.f32.mrb[25].mxu0  ;;  %5453 = vst [vmem:[#allocation35_spill] sm:$0xff] %v4820_v38  ;;  %5454 = vst [vmem:[#allocation36_spill] sm:$0xff] %v4825_v43  ;;  %v1308_v44 = vadd.f32 %v4723_v56, %v4665_v25  ;;  %v4836_v9 = vmul.f32 -1.442695, %v4806_v18  ;;  %v4853_v18 = vadd.f32 %v4765_v13, %v4611_v39 }
 0x236   : > { %v3520_v7 = vpop.eup %3519  ;;  %v1616_v54 = vadd.f32 1.0, %v3518_v33  ;;  %3539 = vpow2.f32 %v2931_v46  ;;  %v4822_v0 = vmul.f32 %v1770_v63, %v1302_v28  ;;  %v1226_v20 = vpop.f32.mrb[26].mxu0  ;;  %v4832_v33 = vmul.f32 %v3506_v2, %v4630_v51 }
 0x237   : > { %v1325_v55 = vpop.f32.mrb[20].mxu1  ;;  %v3522_v45 = vpop.eup %3521  ;;  %v1635_v58 = vadd.f32 1.0, %v3520_v7  ;;  %3541 = vpow2.f32 %v2932_v60  ;;  %v2934_v46 = vmul.f32 -1.442695, %v4810_v59  ;;  %v4841_v60 = vmul.f32 %v3512_v19, %v4624_v49  ;;  %5455 = vst [vmem:[#allocation37_spill] sm:$0xff] %v4853_v18 }
 0x238   : > { %v1228_v17 = vpop.f32.mrb[27].mxu0  ;;  %v4829_v62 = vpop.f32.mrb[21].mxu1  ;;  %3543 = vrcp.f32 %v1616_v54  ;;  %v4844_v63 = vmul.f32 -1.442695, %v4820_v38  ;;  %v1312_v54 = vadd.f32 %v4735_v4, %v4665_v25  ;;  %v2935_v49 = vmul.f32 -1.442695, %v4825_v43 }
 0x239   : > { %v3524_v30 = vpop.eup %3523  ;;  %v4838_v28 = vpop.f32.mrb[22].mxu1  ;;  %3545 = vrcp.f32 %v1635_v58  ;;  %v4857_v58 = vadd.f32 %v1222_v47, %v4586_v23  ;;  %v4870_v43 = vadd.f32 %v1224_v8, %v4591_v24  ;;  %v4873_v47 = vadd.f32 %v1226_v20, %v4586_v23 }
 0x23a   : > { %v3526_v41 = vpop.eup %3525  ;;  %v1638_v56 = vadd.f32 1.0, %v3524_v30  ;;  %v4846_v7 = vpop.f32.mrb[23].mxu1  ;;  %3547 = vrcp.f32 %v1633_v37  ;;  %v4861_v30 = vadd.f32 %v4780_v14, %v4611_v39  ;;  %v1318_v53 = vadd.f32 %v4774_v16, %v4665_v25 }
 0x23b   : > { %v3528_v51 = vpop.eup %3527  ;;  %v1773_v2 = vmul.f32 %v3526_v41, %v4668_v34  ;;  %5456 = vst [vmem:[#allocation38_spill] sm:$0xff] %v4857_v58  ;;  %v1636_v41 = vadd.f32 1.0, %v3522_v45  ;;  %5459 = vst [vmem:[#allocation41_spill] sm:$0xff] %v4870_v43  ;;  %v4879_v45 = vadd.f32 %v1228_v17, %v4591_v24  ;;  %v4886_v8 = vpop.f32.mrb[24].mxu1 }
 0x23c   : > { %v3530_v19 = vpop.eup %3529  ;;  %3549 = vrcp.f32 %v1638_v56  ;;  %5457 = vst [vmem:[#allocation39_spill] sm:$0xff] %v4861_v30  ;;  %v1232_v13 = vpop.f32.mrb[28].mxu0  ;;  %v4867_v56 = vmul.f32 %v3516_v22, %v4643_v3  ;;  %5460 = vst [vmem:[#allocation42_spill] sm:$0xff] %v4873_v47  ;;  %v4884_v22 = vmul.f32 -1.442695, %v4853_v18 }
 0x23d   : > { %v3532_v34 = vpop.eup %3531  ;;  %v1776_v37 = vmul.f32 %v3530_v19, %v4677_v48  ;;  %3551 = vpow2.f32 %v2934_v46  ;;  %v4864_v4 = vmul.f32 %v1773_v2, %v1308_v44  ;;  %v1234_v14 = vpop.f32.mrb[29].mxu0  ;;  %5461 = vst [vmem:[#allocation43_spill] sm:$0xff] %v4879_v45  ;;  %v4889_v46 = vmul.f32 %v3528_v51, %v4656_v12 }
 0x23e   : > { %v3534_v38 = vpop.eup %3533  ;;  %5458 = vst [vmem:[#allocation40_spill] sm:$0xff] %v4867_v56  ;;  %3553 = vpow2.f32 %v4787_v50  ;;  %v1236_v3 = vpop.f32.mrb[30].mxu0  ;;  %v4894_v50 = vadd.f32 %v1325_v55, %v4611_v39  ;;  %v4900_v18 = vmul.f32 -1.442695, %v4861_v30  ;;  %v4905_v51 = vmul.f32 -1.442695, %v4870_v43 }
 0x23f   : > { %v3536_v48 = vpop.eup %3535  ;;  %v4881_v44 = vmul.f32 %v1776_v37, %v1312_v54  ;;  %5462 = vst [vmem:[#allocation44_spill] sm:$0xff] %v4889_v46  ;;  %3555 = vpow2.f32 %v2918_v40  ;;  %v4891_v16 = vpop.f32.mrb[31].mxu0  ;;  %v2937_v37 = vmul.f32 -1.442695, %v4857_v58  ;;  %v2940_v55 = vmul.f32 -1.442695, %v4873_v47 }
 0x240   : > { %v3538_v20 = vpop.eup %3537  ;;  %v1619_v2 = vadd.f32 1.0, %v3536_v48  ;;  %5463 = vst [vmem:[#allocation45_spill] sm:$0xff] %v4894_v50  ;;  %v4896_v17 = vpop.f32.mrb[25].mxu1  ;;  %3557 = vrcp.f32 %v1636_v41  ;;  %v4911_v41 = vmul.f32 %v3532_v34, %v4671_v42  ;;  %v1322_v30 = vadd.f32 %v4793_v21, %v4665_v25 }
 0x241   : > { %5464 = vst [vmem:[#allocation46_spill] sm:$0xff] %v4896_v17  ;;  %v3540_v54 = vpop.eup %3539  ;;  %v1622_v19 = vadd.f32 1.0, %v3538_v20  ;;  %v4902_v56 = vpop.f32.mrb[26].mxu1  ;;  %v4914_v20 = vmul.f32 -1.442695, %v4879_v45  ;;  %v4923_v43 = vadd.f32 %v4829_v62, %v4665_v25  ;;  %v4927_v42 = vadd.f32 %v4838_v28, %v4611_v39 }
 0x242   : > { %v3542_v12 = vpop.eup %3541  ;;  %3559 = vrcp.f32 %v1619_v2  ;;  %v1641_v40 = vadd.f32 1.0, %v3540_v54  ;;  %v4908_v48 = vpop.f32.mrb[27].mxu1  ;;  %5466 = vst [vmem:[#allocation48_spill] sm:$0xff] %v4911_v41  ;;  %v4919_v54 = vmul.f32 -1.442695, %v4894_v50  ;;  %v1639_v45 = vadd.f32 1.0, %v3534_v38 }
 0x243   : > { %5465 = vst [vmem:[#allocation47_spill] sm:$0xff] %v4908_v48  ;;  %v3544_v17 = vpop.eup %3543  ;;  %3561 = vrcp.f32 %v1622_v19  ;;  %v4933_v21 = vadd.f32 %v1232_v13, %v4586_v23  ;;  %v1642_v41 = vadd.f32 1.0, %v3542_v12  ;;  %v4936_v62 = vadd.f32 %v1234_v14, %v4591_v24 }
 0x244   : > { %v3546_v2 = vpop.eup %3545  ;;  %3563 = vrcp.f32 %v1641_v40  ;;  %v1388_v40 = vpop.f32.mrb[32].mxu0 }
 0x245   : > { %v4929_v34 = vpop.eup %3547  ;;  %v1779_v19 = vmul.f32 %v3546_v2, %v4709_v52  ;;  %3565 = vpow2.f32 %v2935_v49  ;;  %v1389_v47 = vadd.f32 %v1388_v40, %v4739_v11  ;;  %v1390_v28 = vpop.f32.mrb[33].mxu0 }
 0x246   : > { %5467 = vst [vmem:[#allocation49_spill] sm:$0xff] %v4929_v34  ;;  %v3550_v50 = vpop.eup %3549  ;;  %3567 = vpow2.f32 %v2937_v37  ;;  %v1760_v34 = vmul.f32 %v3544_v17, %v4698_v6  ;;  %v1391_v49 = vadd.f32 %v1390_v28, %v4768_v35  ;;  %v1392_v13 = vpop.f32.mrb[34].mxu0  ;;  %v4951_v6 = vadd.f32 %v1236_v3, %v4586_v23 }
 0x247   : > { %v3552_v58 = vpop.eup %3551  ;;  %v1782_v52 = vmul.f32 %v3550_v50, %v4727_v61  ;;  %v4941_v38 = vmul.f32 %v1779_v19, %v1318_v53  ;;  %v4944_v2 = vpop.f32.mrb[28].mxu1  ;;  %3569 = vpow2.f32 %v2940_v55  ;;  %v1804_v14 = vmul.f32 %v4784_v57, %v1389_v47 }
 0x248   : > { %v1644_v12 = vadd.f32 1.0, %v3552_v58  ;;  %v1393_v37 = vadd.f32 %v1392_v13, %v4739_v11  ;;  %v1394_v40 = vpop.f32.mrb[35].mxu0  ;;  %v4948_v48 = vpop.f32.mrb[29].mxu1  ;;  %3571 = vrcp.f32 %v1639_v45  ;;  %v4956_v53 = vmul.f32 %v4841_v60, %v1391_v49 }
 0x249   : > { %v3554_v46 = vpop.eup %3553  ;;  %v4953_v61 = vmul.f32 %v1782_v52, %v1322_v30  ;;  %v4958_v50 = vpop.f32.mrb[30].mxu1  ;;  %v1395_v17 = vadd.f32 %v1394_v40, %v4768_v35  ;;  %v1886_v60 = vpack.c.bf16 %v4756_v32, %v4746_v29  ;;  %v4976_v49 = vmul.f32 -1.442695, %v4927_v42 }
 0x24a   : > { %v3556_v58 = vpop.eup %3555  ;;  %3573 = vrcp.f32 %v1644_v12  ;;  %v1625_v57 = vadd.f32 1.0, %v3554_v46  ;;  %v1807_v47 = vmul.f32 %v4801_v10, %v1393_v37  ;;  %v4962_v55 = vpop.f32.mrb[31].mxu1  ;;  %v2943_v46 = vmul.f32 -1.442695, %v4933_v21 }
 0x24b   : > { %v4964_v45 = vpop.eup %3557  ;;  %3575 = vrcp.f32 %v1642_v41  ;;  %v1628_v23 = vadd.f32 1.0, %v3556_v58  ;;  %v1895_v30 = vpack.c.bf16 %v4953_v61, %v4941_v38  ;;  %v4971_v19 = vmul.f32 %v1760_v34, %v1395_v17 }
 0x24c   : > { %v3560_v3 = vpop.eup %3559  ;;  %3577 = vrcp.f32 %v1625_v57  ;;  %v1884_v10 = vpack.c.bf16 %v1807_v47, %v1804_v14  ;;  %v2944_v41 = vmul.f32 -1.442695, %v4936_v62  ;;  %v1398_v13 = vpop.f32.mrb[36].mxu0  ;;  %v2946_v37 = vmul.f32 -1.442695, %v4951_v6 }
 0x24d   : > { %v3562_v28 = vpop.eup %3561  ;;  %v1763_v52 = vmul.f32 %v3560_v3, %v4750_v31  ;;  %3579 = vrcp.f32 %v1628_v23  ;;  %v1885_v34 = vpack.c.bf16 %v4971_v19, %v4956_v53  ;;  %v1399_v14 = vadd.f32 %v1398_v13, %v4739_v11  ;;  %v1400_v40 = vpop.f32.mrb[37].mxu0 }
 0x24e   : > { %v3564_v12 = vpop.eup %3563  ;;  %3581 = vpow2.f32 %v4836_v9  ;;  %2227 = vmatprep.mubr.bf16.mxu0 %v1884_v10  ;;  %v4987_v57 = vadd.f32 %v4891_v16, %v4591_v24  ;;  %v1401_v9 = vadd.f32 %v1400_v40, %v4768_v35  ;;  %v1402_v47 = vpop.f32.mrb[38].mxu0  ;;  %v5468_v17 = vpack.c.bf16 %v4706_v27, %v4703_v26 }
 0x24f   : > { %v3566_v31 = vpop.eup %3565  ;;  %v1785_v58 = vmul.f32 %v3564_v12, %v4763_v5  ;;  %3583 = vpow2.f32 %v4844_v63  ;;  %v1766_v3 = vmul.f32 %v3562_v28, %v4754_v15  ;;  %v1810_v10 = vmul.f32 %v4815_v36, %v1399_v14  ;;  %v1404_v63 = vpop.f32.mrb[39].mxu0 }
 0x250   : > { %2228 = vmatmul.mubr.bf16.vlgmr.msra.gmra.mrb[64].mxu0 %v5468_v17  ;;  %v3568_v23 = vpop.eup %3567  ;;  %3585 = vpow2.f32 %v2943_v46  ;;  %v1403_v5 = vadd.f32 %v1402_v47, %v4739_v11  ;;  %v5000_v16 = vmul.f32 %v1763_v52, %v1401_v9  ;;  %v1645_v26 = vadd.f32 1.0, %v3566_v31 }
 0x251   : > { %v1647_v13 = vadd.f32 1.0, %v3568_v23  ;;  %3587 = vpow2.f32 %v4905_v51  ;;  %v4998_v24 = vmul.f32 %v1785_v58, %v4923_v43  ;;  %v3570_v12 = vpop.eup %3569  ;;  %v1405_v15 = vadd.f32 %v1404_v63, %v4768_v35  ;;  %v5471_v63 = vld [vmem:[#allocation40_spill] sm:$0xff] }
 0x252   : > { %3589 = vpow2.f32 %v2946_v37  ;;  %v1813_v27 = vmul.f32 %v4832_v33, %v1403_v5  ;;  %v5004_v46 = vpop.eup %3571  ;;  %v1650_v36 = vadd.f32 1.0, %v3570_v12  ;;  %v2947_v28 = vmul.f32 -1.442695, %v4987_v57  ;;  %v5470_v5 = vld [vmem:[#allocation33_spill] sm:$0xff] }
 0x253   : > { %3591 = vrcp.f32 %v1647_v13  ;;  %v1332_v51 = vadd.f32 %v4846_v7, %v4665_v25  ;;  %v5012_v52 = vadd.f32 %v4886_v8, %v4611_v39  ;;  %v5014_v37 = vmul.f32 %v1766_v3, %v1405_v15 }
 0x254   : > { %v3574_v43 = vpop.eup %3573  ;;  %3593 = vpow2.f32 %v4914_v20  ;;  %v1887_v33 = vpack.c.bf16 %v1813_v27, %v1810_v10  ;;  %v5021_v31 = vadd.f32 %v4902_v56, %v4611_v39  ;;  %v1408_v7 = vpop.f32.mrb[40].mxu0  ;;  %v1889_v20 = vpack.c.bf16 %v4822_v0, %v4812_v1  ;;  %v5469_v56 = vld [vmem:[#allocation31_spill] sm:$0xff] }
 0x255   : > { %v5016_v14 = vpop.eup %3575  ;;  %v1788_v40 = vmul.f32 %v3574_v43, %v4810_v59  ;;  %3595 = vrcp.f32 %v1650_v36  ;;  %v1409_v8 = vadd.f32 %v1408_v7, %v4739_v11  ;;  %v1410_v9 = vpop.f32.mrb[41].mxu0  ;;  %v5028_v47 = vadd.f32 %v4944_v2, %v4611_v39 }
 0x256   : > { %v3578_v58 = vpop.eup %3577  ;;  %3597 = vrcp.f32 %v1645_v26  ;;  %2237 = vmatprep.mubr.bf16.mxu0 %v1887_v33  ;;  %v1892_v59 = vpack.c.bf16 %v4881_v44, %v4864_v4  ;;  %v1411_v1 = vadd.f32 %v1410_v9, %v4768_v35  ;;  %v1412_v0 = vpop.f32.mrb[42].mxu0 }
 0x257   : > { %v3580_v17 = vpop.eup %3579  ;;  %v1769_v23 = vmul.f32 %v3578_v58, %v5469_v56  ;;  %3599 = vpow2.f32 %v2944_v41  ;;  %v5033_v3 = vmul.f32 %v1788_v40, %v1332_v51  ;;  %v1816_v13 = vmul.f32 %v5471_v63, %v1409_v8  ;;  %v1414_v26 = vpop.f32.mrb[43].mxu0  ;;  %v5473_v8 = vld [vmem:[#allocation46_spill] sm:$0xff] }
 0x258   : > { %2238 = vmatmul.mubr.bf16.gmra.mrb[68].mxu0 %v1886_v60  ;;  %v3582_v10 = vpop.eup %3581  ;;  %v1772_v2 = vmul.f32 %v3580_v17, %v5470_v5  ;;  %3601 = vpow2.f32 %v4884_v22  ;;  %v1413_v12 = vadd.f32 %v1412_v0, %v4739_v11  ;;  %v1415_v36 = vadd.f32 %v1414_v26, %v4768_v35  ;;  %v5472_v60 = vld [vmem:[#allocation44_spill] sm:$0xff] }
 0x259   : > { %v3584_v41 = vpop.eup %3583  ;;  %v1631_v27 = vadd.f32 1.0, %v3582_v10  ;;  %3603 = vpow2.f32 %v4900_v18  ;;  %v5044_v15 = vmul.f32 %v1769_v23, %v1411_v1  ;;  %v1898_v22 = vpack.c.bf16 %v5033_v3, %v4998_v24  ;;  %v5474_v23 = vld [vmem:[#allocation47_spill] sm:$0xff] }
 0x25a   : > { %v3586_v29 = vpop.eup %3585  ;;  %v1634_v32 = vadd.f32 1.0, %v3584_v41  ;;  %3605 = vpow2.f32 %v4919_v54  ;;  %v1819_v51 = vmul.f32 %v5472_v60, %v1413_v12  ;;  %v5051_v40 = vmul.f32 %v1772_v2, %v1415_v36  ;;  %v5475_v2 = vld [vmem:[#allocation38_spill] sm:$0xff] }
 0x25b   : > { %v3588_v43 = vpop.eup %3587  ;;  %3607 = vrcp.f32 %v1631_v27  ;;  %v1653_v33 = vadd.f32 1.0, %v3586_v29  ;;  %v1888_v18 = vpack.c.bf16 %v5014_v37, %v5000_v16  ;;  %v2939_v58 = vmul.f32 -1.442695, %v5012_v52  ;;  %v5476_v60 = vld [vmem:[#allocation42_spill] sm:$0xff] }
 0x25c   : > { %v3590_v7 = vpop.eup %3589  ;;  %3609 = vrcp.f32 %v1634_v32  ;;  %v1338_v54 = vadd.f32 %v5473_v8, %v4665_v25  ;;  %v1890_v9 = vpack.c.bf16 %v1819_v51, %v1816_v13  ;;  %v1342_v1 = vadd.f32 %v5474_v23, %v4665_v25  ;;  %v1418_v0 = vpop.f32.mrb[44].mxu0 }
 0x25d   : > { %v3592_v17 = vpop.eup %3591  ;;  %3611 = vrcp.f32 %v1653_v33  ;;  %v1656_v56 = vadd.f32 1.0, %v3590_v7  ;;  %v2942_v12 = vmul.f32 -1.442695, %v5021_v31  ;;  %v1419_v26 = vadd.f32 %v1418_v0, %v4739_v11  ;;  %v1420_v41 = vpop.f32.mrb[45].mxu0  ;;  %v5477_v33 = vld [vmem:[#allocation48_spill] sm:$0xff] }
 0x25e   : > { %v3594_v5 = vpop.eup %3593  ;;  %v1791_v63 = vmul.f32 %v3592_v17, %v5475_v2  ;;  %3613 = vpow2.f32 %v2947_v28  ;;  %2247 = vmatprep.mubr.bf16.mxu0 %v1890_v9  ;;  %v2945_v27 = vmul.f32 -1.442695, %v5028_v47  ;;  %v5068_v36 = vadd.f32 %v4958_v50, %v4611_v39  ;;  %v1422_v29 = vpop.f32.mrb[46].mxu0  ;;  %v5478_v17 = vld [vmem:[#allocation28_spill] sm:$0xff] }
 0x25f   : > { %v3596_v13 = vpop.eup %3595  ;;  %3615 = vrcp.f32 %v1656_v56  ;;  %v1822_v7 = vmul.f32 %v5477_v33, %v1419_v26  ;;  %v1424_v8 = vpop.f32.mrb[47].mxu0  ;;  %v5479_v56 = vld [vmem:[#allocation49_spill] sm:$0xff]  ;;  %v1423_v39 = vadd.f32 %v1422_v29, %v4739_v11 }
 0x260   : > { %2248 = vmatmul.mubr.bf16.gmra.mrb[72].mxu0 %v1889_v20  ;;  %v5070_v32 = vpop.eup %3597  ;;  %v1794_v28 = vmul.f32 %v3596_v13, %v5476_v60  ;;  %3617 = vpow2.f32 %v4976_v49  ;;  %v5074_v51 = vmul.f32 %v1791_v63, %v1338_v54  ;;  %v1777_v23 = vmul.f32 %v5479_v56, %v5478_v17  ;;  %v5480_v20 = vld [vmem:[#allocation29_spill] sm:$0xff]  ;;  %v5481_v56 = vld [vmem:[#allocation34_spill] sm:$0xff] }
 0x261   : > { %v3600_v9 = vpop.eup %3599  ;;  %3619 = vpow2.f32 %v2939_v58  ;;  %v1780_v0 = vmul.f32 %v4964_v45, %v5480_v20  ;;  %v1648_v54 = vadd.f32 1.0, %v3588_v43  ;;  %v2948_v33 = vmul.f32 -1.442695, %v5068_v36 }
 0x262   : > { %v3602_v50 = vpop.eup %3601  ;;  %3621 = vpow2.f32 %v2942_v12  ;;  %v5082_v2 = vmul.f32 %v1794_v28, %v1342_v1  ;;  %v1825_v26 = vmul.f32 %v1777_v23, %v1423_v39  ;;  %v1421_v58 = vadd.f32 %v1420_v41, %v4768_v35 }
 0x263   : > { %v3604_v49 = vpop.eup %3603  ;;  %v1637_v63 = vadd.f32 1.0, %v3602_v50  ;;  %3623 = vpow2.f32 %v2945_v27  ;;  %v1425_v1 = vadd.f32 %v1424_v8, %v4768_v35  ;;  %v1348_v23 = vadd.f32 %v4948_v48, %v4665_v25 }
 0x264   : > { %v3606_v13 = vpop.eup %3605  ;;  %v1640_v60 = vadd.f32 1.0, %v3604_v49  ;;  %v1901_v29 = vpack.c.bf16 %v5082_v2, %v5074_v51  ;;  %v1428_v12 = vpop.f32.mrb[48].mxu0  ;;  %v1893_v28 = vpack.c.bf16 %v1825_v26, %v1822_v7  ;;  %v1651_v20 = vadd.f32 1.0, %v3594_v5  ;;  %v5482_v49 = vld [vmem:[#allocation35_spill] sm:$0xff]  ;;  %v3458_v51 = vld [vmem:[%s4337_s11 + $0x174] ss:$8 sps:$4 sm:$0xff]  }
 0x265   : > { %v3608_v17 = vpop.eup %3607  ;;  %3625 = vrcp.f32 %v1637_v63  ;;  %v1643_v45 = vadd.f32 1.0, %v3606_v13  ;;  %v1429_v39 = vadd.f32 %v1428_v12, %v4739_v11  ;;  %v1430_v41 = vpop.f32.mrb[49].mxu0  ;;  %v1352_v8 = vadd.f32 %v4962_v55, %v4665_v25 }
 0x266   : > { %v3610_v43 = vpop.eup %3609  ;;  %v1775_v27 = vmul.f32 %v3608_v17, %v5481_v56  ;;  %3627 = vrcp.f32 %v1640_v60  ;;  %2257 = vmatprep.mubr.bf16.mxu0 %v1893_v28  ;;  %v1432_v7 = vpop.f32.mrb[50].mxu0  ;;  %v5483_v17 = vld [vmem:[#allocation30_spill] sm:$0xff]  ;;  %v1654_v28 = vadd.f32 1.0, %v3600_v9  ;;  %v3945_v2 = vmov 0  }
 0x267   : > { %v3612_v50 = vpop.eup %3611  ;;  %v1778_v10 = vmul.f32 %v3610_v43, %v5482_v49  ;;  %3629 = vrcp.f32 %v1643_v45  ;;  %v1828_v48 = vmul.f32 %v1780_v0, %v1429_v39  ;;  %v1434_v5 = vpop.f32.mrb[51].mxu0  ;;  %v1783_v45 = vmul.f32 %v5004_v46, %v5483_v17 }
 0x268   : > { %v3614_v63 = vpop.eup %3613  ;;  %v1797_v26 = vmul.f32 %v3612_v50, %v4933_v21  ;;  %3631 = vpow2.f32 %v2948_v33  ;;  %v5097_v13 = vmul.f32 %v1775_v27, %v1421_v58  ;;  %2258 = vmatmul.mubr.bf16.gmra.mrb[76].mxu0 %v1892_v59  ;;  %v1433_v55 = vadd.f32 %v1432_v7, %v4739_v11  ;;  %v5484_v21 = vld [vmem:[#allocation32_spill] sm:$0xff] }
 0x269   : > { %v3616_v60 = vpop.eup %3615  ;;  %3633 = vrcp.f32 %v1648_v54  ;;  %v5104_v25 = vmul.f32 %v1778_v10, %v1425_v1  ;;  %v1786_v33 = vmul.f32 %v5016_v14, %v5484_v21  ;;  %v5485_v54 = vld [vmem:[#allocation36_spill] sm:$0xff]  ;;  %v1431_v27 = vadd.f32 %v1430_v41, %v4768_v35 }
 0x26a   : > { %v3618_v12 = vpop.eup %3617  ;;  %v1800_v0 = vmul.f32 %v3616_v60, %v4951_v6  ;;  %v5110_v58 = vmul.f32 %v1797_v26, %v1348_v23  ;;  %3635 = vrcp.f32 %v1651_v20  ;;  %v1831_v59 = vmul.f32 %v1783_v45, %v1433_v55  ;;  %v3435_v50 = vld [vmem:[%s4337_s11 + $0x100] ss:$8 sps:$4 sm:$0xff]   ;;  %v3440_v26 = vld [vmem:[%s4337_s11 + $0x114] ss:$8 sps:$4 sm:$0xff]  }
 0x26b   : > { %v3620_v4 = vpop.eup %3619  ;;  %v1646_v44 = vadd.f32 1.0, %v3618_v12  ;;  %v1894_v46 = vpack.c.bf16 %v5104_v25, %v5097_v13  ;;  %v1789_v1 = vmul.f32 %v5070_v32, %v5485_v54  ;;  %v1435_v60 = vadd.f32 %v1434_v5, %v4768_v35  ;;  %v5486_v45 = vld [vmem:[#allocation37_spill] sm:$0xff]  ;;  %v5487_v5 = vld [vmem:[#allocation39_spill] sm:$0xff] }
 0x26c   : > { %v3622_v10 = vpop.eup %3621  ;;  %v1649_v43 = vadd.f32 1.0, %v3620_v4  ;;  %v5116_v14 = vmul.f32 %v1800_v0, %v1352_v8  ;;  %v1438_v23 = vpop.f32.mrb[52].mxu0  ;;  %v1896_v39 = vpack.c.bf16 %v1831_v59, %v1828_v48  ;;  %v1657_v8 = vadd.f32 1.0, %v3614_v63 }
 0x26d   : > { %v3624_v6 = vpop.eup %3623  ;;  %3637 = vrcp.f32 %v1646_v44  ;;  %v1652_v56 = vadd.f32 1.0, %v3622_v10  ;;  %v1439_v49 = vadd.f32 %v1438_v23, %v4739_v11  ;;  %v1440_v7 = vpop.f32.mrb[53].mxu0  ;;  %v3438_v44 = vld [vmem:[%s4337_s11 + $0x110] ss:$8 sps:$4 sm:$0xff]  }
 0x26e   : > { %3639 = vrcp.f32 %v1649_v43  ;;  %v1655_v20 = vadd.f32 1.0, %v3624_v6  ;;  %v1904_v32 = vpack.c.bf16 %v5116_v14, %v5110_v58  ;;  %v1441_v41 = vadd.f32 %v1440_v7, %v4768_v35  ;;  %2267 = vmatprep.mubr.bf16.mxu1 %v1896_v39  ;;  %v1442_v48 = vpop.f32.mrb[54].mxu0  ;;  %v5488_v10 = vld [vmem:[#allocation45_spill] sm:$0xff]  ;;  %v3443_v6 = vld [vmem:[%s4337_s11 + $0x124] ss:$8 sps:$4 sm:$0xff]  }
 0x26f   : > { %v3626_v9 = vpop.eup %3625  ;;  %3641 = vrcp.f32 %v1652_v56  ;;  %v1834_v12 = vmul.f32 %v1786_v33, %v1439_v49  ;;  %v1443_v21 = vadd.f32 %v1442_v48, %v4739_v11  ;;  %2268 = vmatmul.mubr.bf16.vlgmr.msra.gmra.mrb[32].mxu1 %v1895_v30  ;;  %v1444_v63 = vpop.f32.mrb[55].mxu0 }
 0x270   : > { %v3628_v17 = vpop.eup %3627  ;;  %v1781_v55 = vmul.f32 %v3626_v9, %v5486_v45  ;;  %3643 = vrcp.f32 %v1655_v20  ;;  %2309 = vmatpush1.bf16.msra.mxu1 %v3435_v50  ;;  %v3441_v50 = vld [vmem:[%s4337_s11 + $0x120] ss:$8 sps:$4 sm:$0xff]   ;;  %v1445_v49 = vadd.f32 %v1444_v63, %v4768_v35  ;;  %v3446_v9 = vld [vmem:[%s4337_s11 + $0x134] ss:$8 sps:$4 sm:$0xff]  }
 0x271   : > { %v3630_v0 = vpop.eup %3629  ;;  %3645 = vrcp.f32 %v1654_v28  ;;  %v1784_v4 = vmul.f32 %v3628_v17, %v5487_v5  ;;  %v1837_v33 = vmul.f32 %v1789_v1, %v1443_v21  ;;  %2310 = vmatprep.subr.bf16.mxu1 %v3440_v26  ;;  %v5489_v1 = vld [vmem:[#allocation41_spill] sm:$0xff]  ;;  %v5490_v17 = vld [vmem:[#allocation43_spill] sm:$0xff] }
 0x272   : > { %v3632_v59 = vpop.eup %3631  ;;  %v1787_v54 = vmul.f32 %v3630_v0, %v5488_v10  ;;  %v5134_v43 = vmul.f32 %v1781_v55, %v1431_v27  ;;  %3647 = vrcp.f32 %v1657_v8 }
 0x273   : > { %v3634_v56 = vpop.eup %3633  ;;  %v1658_v38 = vadd.f32 1.0, %v3632_v59  ;;  %v5137_v61 = vmul.f32 %v1784_v4, %v1435_v60  ;;  %v1899_v28 = vpack.c.bf16 %v1837_v33, %v1834_v12  ;;  %v3449_v33 = vld [vmem:[%s4337_s11 + $0x144] ss:$8 sps:$4 sm:$0xff]  }
 0x274   : > { %v5139_v30 = vmul.f32 %v1787_v54, %v1441_v41  ;;  %v3636_v23 = vpop.eup %3635  ;;  %2311 = vmatpush1.bf16.msra.mxu1 %v3438_v44  ;;  %v1448_v39 = vpop.f32.mrb[56].mxu0  ;;  %v1792_v20 = vmul.f32 %v3634_v56, %v5489_v1  ;;  %v3444_v44 = vld [vmem:[%s4337_s11 + $0x130] ss:$8 sps:$4 sm:$0xff]   ;;  %v3452_v1 = vld [vmem:[%s4337_s11 + $0x154] ss:$8 sps:$4 sm:$0xff]  }
 0x275   : > { %3649 = vrcp.f32 %v1658_v38  ;;  %v1897_v27 = vpack.c.bf16 %v5137_v61, %v5134_v43  ;;  %v1449_v7 = vadd.f32 %v1448_v39, %v4739_v11  ;;  %v1450_v26 = vpop.f32.mrb[57].mxu0  ;;  %2277 = vmatprep.mubr.bf16.mxu1 %v1899_v28  ;;  %2312 = vmatprep.subr.bf16.mxu1 %v3443_v6  ;;  %v1795_v45 = vmul.f32 %v3636_v23, %v5490_v17  ;;  %v3447_v23 = vld [vmem:[%s4337_s11 + $0x140] ss:$8 sps:$4 sm:$0xff]  }
 0x276   : > { %v1451_v60 = vadd.f32 %v1450_v26, %v4768_v35  ;;  %v1452_v41 = vpop.f32.mrb[58].mxu0 }
 0x277   : > { %v3638_v8 = vpop.eup %3637  ;;  %v1840_v12 = vmul.f32 %v1792_v20, %v1449_v7  ;;  %v1453_v21 = vadd.f32 %v1452_v41, %v4739_v11  ;;  %2278 = vmatmul.mubr.bf16.gmra.mrb[36].mxu1 %v1898_v22  ;;  %v1454_v63 = vpop.f32.mrb[59].mxu0 }
 0x278   : > { %v3640_v48 = vpop.eup %3639  ;;  %v1790_v55 = vmul.f32 %v3638_v8, %v4927_v42  ;;  %v1455_v4 = vadd.f32 %v1454_v63, %v4768_v35  ;;  %2313 = vmatpush1.bf16.msra.mxu1 %v3441_v50  ;;  %v1852_v63 = vld [vmem:[#allocation2 + $0x8] sm:$0xff] }
 0x279   : > { %v3642_v0 = vpop.eup %3641  ;;  %v1793_v5 = vmul.f32 %v3640_v48, %v5012_v52  ;;  %v1843_v54 = vmul.f32 %v1795_v45, %v1453_v21  ;;  %2314 = vmatprep.subr.bf16.mxu1 %v3446_v9  ;;  %v3450_v48 = vld [vmem:[%s4337_s11 + $0x150] ss:$8 sps:$4 sm:$0xff]  }
 0x27a   : > { %v3644_v59 = vpop.eup %3643  ;;  %v1796_v10 = vmul.f32 %v3642_v0, %v5021_v31  ;;  %v1838_v42 = vmul.f32 %v1790_v55, %v1445_v49  ;;  %v3453_v55 = vld [vmem:[%s4337_s11 + $0x160] ss:$8 sps:$4 sm:$0xff]  }
 0x27b   : > { %v3646_v6 = vpop.eup %3645  ;;  %v1841_v24 = vmul.f32 %v1793_v5, %v1451_v60  ;;  %v1902_v22 = vpack.c.bf16 %v1843_v54, %v1840_v12  ;;  %v1799_v38 = vmul.f32 %v3644_v59, %v5028_v47 }
 0x27c   : > { %v1844_v3 = vmul.f32 %v1796_v10, %v1455_v4  ;;  %v1900_v56 = vpack.c.bf16 %v1838_v42, %v5139_v30  ;;  %v3648_v52 = vpop.eup %3647  ;;  %2315 = vmatpush1.bf16.msra.mxu1 %v3444_v44  ;;  %v1458_v28 = vpop.f32.mrb[60].mxu0  ;;  %v1798_v39 = vmul.f32 %v3646_v6, %v4936_v62  ;;  %v1853_v4 = vld [vmem:[#allocation2 + $0x10] sm:$0xff]  ;;  %v1854_v42 = vld [vmem:[#allocation2 + $0x18] sm:$0xff] }
 0x27d   : > { %v1459_v31 = vadd.f32 %v1458_v28, %v4739_v11  ;;  %v1460_v50 = vpop.f32.mrb[61].mxu0  ;;  %2287 = vmatprep.mubr.bf16.mxu1 %v1902_v22  ;;  %2316 = vmatprep.subr.bf16.mxu1 %v3449_v33  ;;  %v1801_v47 = vmul.f32 %v3648_v52, %v4987_v57  ;;  %v3455_v57 = vld [vmem:[%s4337_s11 + $0x164] ss:$8 sps:$4 sm:$0xff]   ;;  %v1855_v22 = vld [vmem:[#allocation2 + $0x20] sm:$0xff] }
 0x27e   : > { %v1903_v20 = vpack.c.bf16 %v1844_v3, %v1841_v24  ;;  %v1461_v30 = vadd.f32 %v1460_v50, %v4768_v35  ;;  %v1462_v7 = vpop.f32.mrb[62].mxu0 }
 0x27f   : > { %v3650_v49 = vpop.eup %3649  ;;  %v1846_v9 = vmul.f32 %v1798_v39, %v1459_v31  ;;  %v1463_v62 = vadd.f32 %v1462_v7, %v4739_v11  ;;  %2288 = vmatmul.mubr.bf16.gmra.mrb[40].mxu1 %v1901_v29  ;;  %v1464_v8 = vpop.f32.mrb[63].mxu0  ;;  %v5491_v29 = vpack.c.bf16 %v5051_v40, %v5044_v15  ;;  %v1857_v39 = vld [vmem:[#allocation2 + $0x30] sm:$0xff] }
 0x280   : > { %v1802_v26 = vmul.f32 %v3650_v49, %v5068_v36  ;;  %v1847_v60 = vmul.f32 %v1799_v38, %v1461_v30  ;;  %v1465_v41 = vadd.f32 %v1464_v8, %v4768_v35  ;;  %2317 = vmatpush1.bf16.msra.mxu1 %v3447_v23  ;;  %v3456_v35 = vld [vmem:[%s4337_s11 + $0x170] ss:$8 sps:$4 sm:$0xff]   ;;  %v1856_v38 = vld [vmem:[#allocation2 + $0x28] sm:$0xff] }
 0x281   : > { %v1849_v17 = vmul.f32 %v1801_v47, %v1463_v62  ;;  %2318 = vmatprep.subr.bf16.mxu1 %v3452_v1 }
 0x282   : > { %v1850_v45 = vmul.f32 %v1802_v26, %v1465_v41 }
 0x283   : > { %v1905_v36 = vpack.c.bf16 %v1849_v17, %v1846_v9  ;;  %v1859_v9 = vld [vmem:[#allocation2 + $0x40] sm:$0xff]  ;;  %v1861_v17 = vld [vmem:[#allocation2 + $0x50] sm:$0xff] }
 0x284   : > { %2319 = vmatpush1.bf16.msra.mxu1 %v3450_v48  ;;  %v1906_v11 = vpack.c.bf16 %v1850_v45, %v1847_v60  ;;  %v1860_v60 = vld [vmem:[#allocation2 + $0x48] sm:$0xff] }
 0x285   : > { %2297 = vmatprep.mubr.bf16.mxu1 %v1905_v36  ;;  %2320 = vmatprep.subr.bf16.mxu1 %v3455_v57 }
 0x287   : > { %2298 = vmatmul.mubr.bf16.gmra.mrb[44].mxu1 %v1904_v32 }
 0x288   : > { %2321 = vmatpush1.bf16.msra.mxu1 %v3453_v55  ;;  %2340 = vmatprep.mubr.bf16.mxu1 %v3945_v2  ;;  %v1862_v55 = vld [vmem:[#allocation2 + $0x58] sm:$0xff] }
 0x289   : > { %2322 = vmatprep.subr.bf16.mxu1 %v3458_v51 }
 0x28c   : > { %2323 = vmatpush1.bf16.msra.mxu1 %v3456_v35 }
 0x28f   : > { %2341 = vmatmul.mubr.bf16.vlgmr.msra.gmra.mrb[48].mxu1 %v1885_v34 }
 0x290   : > { %2350 = vmatprep.mubr.bf16.mxu1 %v3945_v2 }
 0x297   : > { %2351 = vmatmul.mubr.bf16.gmra.mrb[52].mxu1 %v1888_v18 }
 0x298   : > { %2360 = vmatprep.mubr.bf16.mxu1 %v3945_v2 }
 0x29f   : > { %2361 = vmatmul.mubr.bf16.gmra.mrb[56].mxu1 %v5491_v29 }
 0x2a0   : > { %2370 = vmatprep.mubr.bf16.mxu1 %v3945_v2 }
 0x2a7   : > { %2371 = vmatmul.mubr.bf16.gmra.mrb[60].mxu1 %v1894_v46 }
 0x2a8   : > { %2380 = vmatprep.mubr.bf16.mxu1 %v3945_v2 }
 0x2af   : > { %2381 = vmatmul.mubr.bf16.gmra.mrb[32].mxu1 %v1897_v27  ;;  %v1851_v27 = vld [vmem:[#allocation2] sm:$0xff] }
 0x2b0   : > { %2390 = vmatprep.mubr.bf16.mxu1 %v3945_v2 }
 0x2b7   : > { %2391 = vmatmul.mubr.bf16.gmra.mrb[36].mxu1 %v1900_v56 }
 0x2b8   : > { %2400 = vmatprep.mubr.bf16.mxu1 %v3945_v2 }
 0x2bf   : > { %2401 = vmatmul.mubr.bf16.gmra.mrb[40].mxu1 %v1903_v20  ;;  %v1858_v20 = vld [vmem:[#allocation2 + $0x38] sm:$0xff] }
 0x2c0   : > { %2410 = vmatprep.mubr.bf16.mxu1 %v3945_v2 }
 0x2c7   : > { %2411 = vmatmul.mubr.bf16.gmra.mrb[44].mxu1 %v1906_v11 }
 0x323   : > { %v2229_v53 = vpop.f32.mrb[64].mxu0 }
 0x324   : > { %v2231_v19 = vpop.f32.mrb[65].mxu0 }
 0x325   : > { %v2233_v34 = vpop.f32.mrb[66].mxu0 }
 0x326   : > { %v2235_v16 = vpop.f32.mrb[67].mxu0 }
 0x32b   : > { %v2239_v37 = vpop.f32.mrb[68].mxu0 }
 0x32c   : > { %v2241_v15 = vpop.f32.mrb[69].mxu0 }
 0x32d   : > { %v2243_v40 = vpop.f32.mrb[70].mxu0 }
 0x32e   : > { %v2245_v18 = vpop.f32.mrb[71].mxu0 }
 0x333   : > { %v2249_v13 = vpop.f32.mrb[72].mxu0 }
 0x334   : > { %v2251_v25 = vpop.f32.mrb[73].mxu0 }
 0x335   : > { %v2253_v58 = vpop.f32.mrb[74].mxu0 }
 0x336   : > { %v2255_v46 = vpop.f32.mrb[75].mxu0 }
 0x33b   : > { %v5197_v14 = vpop.f32.mrb[76].mxu0 }
 0x33c   : > { %v5199_v32 = vpop.f32.mrb[77].mxu0 }
 0x33d   : > { %v5201_v43 = vpop.f32.mrb[78].mxu0 }
 0x33e   : > { %v5203_v61 = vpop.f32.mrb[79].mxu0 }
 0x362   : > { %v2342_v12 = vpop.f32.mrb[48].mxu1 }
 0x363   : > { %v2343_v21 = vadd.f32 %v2342_v12, %v2229_v53  ;;  %v2344_v0 = vpop.f32.mrb[49].mxu1  ;;  %v1863_v53 = vld [vmem:[#allocation2 + $0x60] sm:$0xff] }
 0x364   : > { %v2345_v5 = vadd.f32 %v2344_v0, %v2231_v19  ;;  %v2346_v44 = vpop.f32.mrb[50].mxu1  ;;  %v1867_v0 = vld [vmem:[#allocation2 + $0x80] sm:$0xff] }
 0x365   : > { %v2421_v59 = vadd.f32 %v2343_v21, %v1851_v27  ;;  %v2347_v10 = vadd.f32 %v2346_v44, %v2233_v34  ;;  %v2348_v54 = vpop.f32.mrb[51].mxu1 }
 0x366   : > { %v2422_v33 = vadd.f32 %v2345_v5, %v1852_v63  ;;  %v2349_v6 = vadd.f32 %v2348_v54, %v2235_v16  ;;  %v1864_v16 = vld [vmem:[#allocation2 + $0x68] sm:$0xff] }
 0x367   : > { %2453 = vst [vmem:[#allocation2] sm:$0xff] %v2421_v59  ;;  %v2423_v24 = vadd.f32 %v2347_v10, %v1853_v4  ;;  %v1870_v59 = vld [vmem:[#allocation2 + $0x98] sm:$0xff] }
 0x368   : > { %2454 = vst [vmem:[#allocation2 + $0x8] sm:$0xff] %v2422_v33  ;;  %v2424_v3 = vadd.f32 %v2349_v6, %v1854_v42  ;;  %v1871_v33 = vld [vmem:[#allocation2 + $0xa0] sm:$0xff]  ;;  %v1872_v6 = vld [vmem:[#allocation2 + $0xa8] sm:$0xff] }
 0x369   : > { %2455 = vst [vmem:[#allocation2 + $0x10] sm:$0xff] %v2423_v24 }
 0x36a   : > { %2456 = vst [vmem:[#allocation2 + $0x18] sm:$0xff] %v2424_v3  ;;  %v2352_v56 = vpop.f32.mrb[52].mxu1  ;;  %v1873_v3 = vld [vmem:[#allocation2 + $0xb0] sm:$0xff] }
 0x36b   : > { %v2353_v52 = vadd.f32 %v2352_v56, %v2239_v37  ;;  %v2354_v28 = vpop.f32.mrb[53].mxu1 }
 0x36c   : > { %v2355_v23 = vadd.f32 %v2354_v28, %v2241_v15  ;;  %v2356_v31 = vpop.f32.mrb[54].mxu1 }
 0x36d   : > { %v2425_v50 = vadd.f32 %v2353_v52, %v1855_v22  ;;  %v2357_v1 = vadd.f32 %v2356_v31, %v2243_v40  ;;  %v2358_v49 = vpop.f32.mrb[55].mxu1  ;;  %v1865_v40 = vld [vmem:[#allocation2 + $0x70] sm:$0xff]  ;;  %v1874_v52 = vld [vmem:[#allocation2 + $0xb8] sm:$0xff] }
 0x36e   : > { %v2426_v30 = vadd.f32 %v2355_v23, %v1856_v38  ;;  %v2359_v7 = vadd.f32 %v2358_v49, %v2245_v18  ;;  %v1877_v49 = vld [vmem:[#allocation2 + $0xd0] sm:$0xff] }
 0x36f   : > { %2457 = vst [vmem:[#allocation2 + $0x20] sm:$0xff] %v2425_v50  ;;  %v2427_v47 = vadd.f32 %v2357_v1, %v1857_v39  ;;  %v1875_v50 = vld [vmem:[#allocation2 + $0xc0] sm:$0xff]  ;;  %v1876_v1 = vld [vmem:[#allocation2 + $0xc8] sm:$0xff] }
 0x370   : > { %2458 = vst [vmem:[#allocation2 + $0x28] sm:$0xff] %v2426_v30  ;;  %v2428_v26 = vadd.f32 %v2359_v7, %v1858_v20 }
 0x371   : > { %2459 = vst [vmem:[#allocation2 + $0x30] sm:$0xff] %v2427_v47  ;;  %v1878_v47 = vld [vmem:[#allocation2 + $0xd8] sm:$0xff] }
 0x372   : > { %2460 = vst [vmem:[#allocation2 + $0x38] sm:$0xff] %v2428_v26  ;;  %v2362_v62 = vpop.f32.mrb[56].mxu1 }
 0x373   : > { %v2363_v8 = vadd.f32 %v2362_v62, %v2249_v13  ;;  %v2364_v41 = vpop.f32.mrb[57].mxu1 }
 0x374   : > { %v2365_v48 = vadd.f32 %v2364_v41, %v2251_v25  ;;  %v2366_v57 = vpop.f32.mrb[58].mxu1  ;;  %v1879_v41 = vld [vmem:[#allocation2 + $0xe0] sm:$0xff] }
 0x375   : > { %v2429_v45 = vadd.f32 %v2363_v8, %v1859_v9  ;;  %v2367_v36 = vadd.f32 %v2366_v57, %v2253_v58  ;;  %v2368_v11 = vpop.f32.mrb[59].mxu1  ;;  %v1866_v58 = vld [vmem:[#allocation2 + $0x78] sm:$0xff]  ;;  %v1881_v57 = vld [vmem:[#allocation2 + $0xf0] sm:$0xff] }
 0x376   : > { %v2430_v51 = vadd.f32 %v2365_v48, %v1860_v60  ;;  %v2369_v35 = vadd.f32 %v2368_v11, %v2255_v46  ;;  %v1880_v48 = vld [vmem:[#allocation2 + $0xe8] sm:$0xff] }
 0x377   : > { %2461 = vst [vmem:[#allocation2 + $0x40] sm:$0xff] %v2429_v45  ;;  %v2431_v2 = vadd.f32 %v2367_v36, %v1861_v17 }
 0x378   : > { %2462 = vst [vmem:[#allocation2 + $0x48] sm:$0xff] %v2430_v51  ;;  %v2432_v29 = vadd.f32 %v2369_v35, %v1862_v55  ;;  %v1882_v55 = vld [vmem:[#allocation2 + $0xf8] sm:$0xff] }
 0x379   : > { %2463 = vst [vmem:[#allocation2 + $0x50] sm:$0xff] %v2431_v2 }
 0x37a   : > { %2464 = vst [vmem:[#allocation2 + $0x58] sm:$0xff] %v2432_v29  ;;  %v2372_v19 = vpop.f32.mrb[60].mxu1 }
 0x37b   : > { %v2373_v34 = vadd.f32 %v2372_v19, %v5197_v14  ;;  %v2374_v37 = vpop.f32.mrb[61].mxu1  ;;  %v1868_v14 = vld [vmem:[#allocation2 + $0x88] sm:$0xff] }
 0x37c   : > { %v2375_v15 = vadd.f32 %v2374_v37, %v5199_v32  ;;  %v2376_v18 = vpop.f32.mrb[62].mxu1  ;;  %v1869_v32 = vld [vmem:[#allocation2 + $0x90] sm:$0xff]  ;;  %v2521_v19 = vld [vmem:[#allocation11] sm:$0x3] (!%p2997_p12) }
 0x37d   : > { %v2433_v13 = vadd.f32 %v2373_v34, %v1863_v53  ;;  %v2377_v25 = vadd.f32 %v2376_v18, %v5201_v43  ;;  %v2378_v46 = vpop.f32.mrb[63].mxu1  ;;  %v2489_v53 = vld [vmem:[#allocation2] sm:$0xff] (!%p2997_p12)  ;;  %v2490_v34 = vld [vmem:[#allocation2 + $0x8] sm:$0xff] (!%p2997_p12) }
 0x37e   : > { %v2434_v27 = vadd.f32 %v2375_v15, %v1864_v16  ;;  %v2379_v12 = vadd.f32 %v2378_v46, %v5203_v61  ;;  %v5493_v16 = vld [vmem:[#allocation27_spill] sm:$0xff] (!%p2997_p12) }
 0x37f   : > { %2465 = vst [vmem:[#allocation2 + $0x60] sm:$0xff] %v2433_v13  ;;  %v2435_v21 = vadd.f32 %v2377_v25, %v1865_v40  ;;  %v5494_v37 = vsub.s32 (!%p2997_p12), 0, %v5493_v16  ;;  %v5495_v40 = vsub.s32 (!%p2997_p12), 1, %v5493_v16  ;;  %v2491_v13 = vld [vmem:[#allocation2 + $0x10] sm:$0xff] (!%p2997_p12)  ;;  %v2492_v25 = vld [vmem:[#allocation2 + $0x18] sm:$0xff] (!%p2997_p12)  ;;  %v2494_v46 = vld [vmem:[#allocation2 + $0x28] sm:$0xff] (!%p2997_p12) }
 0x380   : > { %2466 = vst [vmem:[#allocation2 + $0x68] sm:$0xff] %v2434_v27  ;;  %v2436_v63 = vadd.f32 %v2379_v12, %v1866_v58  ;;  %v2493_v58 = vld [vmem:[#allocation2 + $0x20] sm:$0xff] (!%p2997_p12)  ;;  %v2495_v27 = vld [vmem:[#allocation2 + $0x30] sm:$0xff] (!%p2997_p12)  ;;  %v2496_v12 = vld [vmem:[#allocation2 + $0x38] sm:$0xff] (!%p2997_p12) }
 0x381   : > { %2467 = vst [vmem:[#allocation2 + $0x70] sm:$0xff] %v2435_v21  ;;  %v5212_v15 = vrot.slane (!%p2997_p12), %v2521_v19, %v5494_v37  ;;  %v5216_v18 = vrot.slane (!%p2997_p12), %v2521_v19, %v5495_v40 }
 0x382   : > { %2468 = vst [vmem:[#allocation2 + $0x78] sm:$0xff] %v2436_v63  ;;  %v2382_v5 = vpop.f32.mrb[32].mxu1 }
 0x383   : > { %v2437_v4 = vadd.f32 %v2382_v5, %v1867_v0  ;;  %v2384_v44 = vpop.f32.mrb[33].mxu1  ;;  %v2533_v21 = vadd.f32 (!%p2997_p12), %v5212_v15, %v2489_v53  ;;  %v2534_v63 = vadd.f32 (!%p2997_p12), %v5216_v18, %v2490_v34  ;;  %v2535_v0 = vadd.f32 (!%p2997_p12), %v5212_v15, %v2491_v13  ;;  %v2497_v5 = vld [vmem:[#allocation2 + $0x40] sm:$0xff] (!%p2997_p12) }
 0x384   : > { %v2438_v10 = vadd.f32 %v2384_v44, %v1868_v14  ;;  %v2386_v43 = vpop.f32.mrb[34].mxu1  ;;  %v2536_v14 = vadd.f32 (!%p2997_p12), %v5216_v18, %v2492_v25  ;;  %v2537_v44 = vadd.f32 (!%p2997_p12), %v5212_v15, %v2493_v58 }
 0x385   : > { %2469 = vst [vmem:[#allocation2 + $0x80] sm:$0xff] %v2437_v4  ;;  %v2439_v42 = vadd.f32 %v2386_v43, %v1869_v32  ;;  %v2388_v54 = vpop.f32.mrb[35].mxu1  ;;  %v2498_v32 = vld [vmem:[#allocation2 + $0x48] sm:$0xff] (!%p2997_p12)  ;;  %v2499_v4 = vld [vmem:[#allocation2 + $0x50] sm:$0xff] (!%p2997_p12)  ;;  %v2540_v43 = vadd.f32 (!%p2997_p12), %v5216_v18, %v2496_v12  ;;  %2565 = vst [vmem:[%s4348_s25] sm:$0xff] (!%p2997_p12), %v2533_v21 }
 0x386   : > { %2470 = vst [vmem:[#allocation2 + $0x88] sm:$0xff] %v2438_v10  ;;  %v2440_v61 = vadd.f32 %v2388_v54, %v1870_v59  ;;  %v2538_v59 = vadd.f32 (!%p2997_p12), %v5216_v18, %v2494_v46  ;;  %v2539_v10 = vadd.f32 (!%p2997_p12), %v5212_v15, %v2495_v27  ;;  %v2501_v54 = vld [vmem:[#allocation2 + $0x60] sm:$0xff] (!%p2997_p12)  ;;  %2566 = vst [vmem:[%s4348_s25 + $0x8] sm:$0xff] (!%p2997_p12), %v2534_v63 }
 0x387   : > { %2471 = vst [vmem:[#allocation2 + $0x90] sm:$0xff] %v2439_v42  ;;  %v2500_v42 = vld [vmem:[#allocation2 + $0x58] sm:$0xff] (!%p2997_p12)  ;;  %2567 = vst [vmem:[%s4348_s25 + $0x10] sm:$0xff] (!%p2997_p12), %v2535_v0 }
 0x388   : > { %2472 = vst [vmem:[#allocation2 + $0x98] sm:$0xff] %v2440_v61  ;;  %v2502_v61 = vld [vmem:[#allocation2 + $0x68] sm:$0xff] (!%p2997_p12)  ;;  %2568 = vst [vmem:[%s4348_s25 + $0x18] sm:$0xff] (!%p2997_p12), %v2536_v14 }
 0x389   : > { %2569 = vst [vmem:[%s4348_s25 + $0x20] sm:$0xff] (!%p2997_p12), %v2537_v44  ;;  %2570 = vst [vmem:[%s4348_s25 + $0x28] sm:$0xff] (!%p2997_p12), %v2538_v59 }
 0x38a   : > { %v2392_v24 = vpop.f32.mrb[36].mxu1  ;;  %2571 = vst [vmem:[%s4348_s25 + $0x30] sm:$0xff] (!%p2997_p12), %v2539_v10  ;;  %2572 = vst [vmem:[%s4348_s25 + $0x38] sm:$0xff] (!%p2997_p12), %v2540_v43 }
 0x38b   : > { %v2441_v22 = vadd.f32 %v2392_v24, %v1871_v33  ;;  %v2394_v56 = vpop.f32.mrb[37].mxu1  ;;  %v2541_v33 = vadd.f32 (!%p2997_p12), %v5212_v15, %v2497_v5  ;;  %v2543_v24 = vadd.f32 (!%p2997_p12), %v5212_v15, %v2499_v4 }
 0x38c   : > { %v2442_v38 = vadd.f32 %v2394_v56, %v1872_v6  ;;  %v2396_v28 = vpop.f32.mrb[38].mxu1  ;;  %v2542_v6 = vadd.f32 (!%p2997_p12), %v5216_v18, %v2498_v32  ;;  %v2504_v56 = vld [vmem:[#allocation2 + $0x78] sm:$0xff] (!%p2997_p12) }
 0x38d   : > { %2473 = vst [vmem:[#allocation2 + $0xa0] sm:$0xff] %v2441_v22  ;;  %v2443_v23 = vadd.f32 %v2396_v28, %v1873_v3  ;;  %v2398_v39 = vpop.f32.mrb[39].mxu1  ;;  %v2544_v3 = vadd.f32 (!%p2997_p12), %v5216_v18, %v2500_v42  ;;  %v2503_v22 = vld [vmem:[#allocation2 + $0x70] sm:$0xff] (!%p2997_p12)  ;;  %v2546_v28 = vadd.f32 (!%p2997_p12), %v5216_v18, %v2502_v61  ;;  %2573 = vst [vmem:[%s4348_s25 + $0x40] sm:$0xff] (!%p2997_p12), %v2541_v33 }
 0x38e   : > { %2474 = vst [vmem:[#allocation2 + $0xa8] sm:$0xff] %v2442_v38  ;;  %v2444_v31 = vadd.f32 %v2398_v39, %v1874_v52  ;;  %v2505_v52 = vld [vmem:[#allocation2 + $0x80] sm:$0xff] (!%p2997_p12)  ;;  %v2545_v38 = vadd.f32 (!%p2997_p12), %v5212_v15, %v2501_v54  ;;  %v2548_v39 = vadd.f32 (!%p2997_p12), %v5216_v18, %v2504_v56  ;;  %2574 = vst [vmem:[%s4348_s25 + $0x48] sm:$0xff] (!%p2997_p12), %v2542_v6 }
 0x38f   : > { %2475 = vst [vmem:[#allocation2 + $0xb0] sm:$0xff] %v2443_v23  ;;  %v2547_v23 = vadd.f32 (!%p2997_p12), %v5212_v15, %v2503_v22  ;;  %2575 = vst [vmem:[%s4348_s25 + $0x50] sm:$0xff] (!%p2997_p12), %v2543_v24 }
 0x390   : > { %2476 = vst [vmem:[#allocation2 + $0xb8] sm:$0xff] %v2444_v31  ;;  %v2506_v31 = vld [vmem:[#allocation2 + $0x88] sm:$0xff] (!%p2997_p12)  ;;  %2576 = vst [vmem:[%s4348_s25 + $0x58] sm:$0xff] (!%p2997_p12), %v2544_v3 }
 0x391   : > { %2577 = vst [vmem:[%s4348_s25 + $0x60] sm:$0xff] (!%p2997_p12), %v2545_v38  ;;  %2578 = vst [vmem:[%s4348_s25 + $0x68] sm:$0xff] (!%p2997_p12), %v2546_v28 }
 0x392   : > { %v2402_v20 = vpop.f32.mrb[40].mxu1  ;;  %2579 = vst [vmem:[%s4348_s25 + $0x70] sm:$0xff] (!%p2997_p12), %v2547_v23  ;;  %2580 = vst [vmem:[%s4348_s25 + $0x78] sm:$0xff] (!%p2997_p12), %v2548_v39 }
 0x393   : > { %v2445_v30 = vadd.f32 %v2402_v20, %v1875_v50  ;;  %v2404_v7 = vpop.f32.mrb[41].mxu1  ;;  %v2507_v50 = vld [vmem:[#allocation2 + $0x90] sm:$0xff] (!%p2997_p12)  ;;  %v2549_v20 = vadd.f32 (!%p2997_p12), %v5212_v15, %v2505_v52 }
 0x394   : > { %v2446_v26 = vadd.f32 %v2404_v7, %v1876_v1  ;;  %v2406_v9 = vpop.f32.mrb[42].mxu1  ;;  %v2508_v1 = vld [vmem:[#allocation2 + $0x98] sm:$0xff] (!%p2997_p12) }
 0x395   : > { %2477 = vst [vmem:[#allocation2 + $0xc0] sm:$0xff] %v2445_v30  ;;  %v2447_v62 = vadd.f32 %v2406_v9, %v1877_v49  ;;  %v2408_v8 = vpop.f32.mrb[43].mxu1  ;;  %v2550_v49 = vadd.f32 (!%p2997_p12), %v5216_v18, %v2506_v31  ;;  %v2551_v30 = vadd.f32 (!%p2997_p12), %v5212_v15, %v2507_v50  ;;  %v2552_v7 = vadd.f32 (!%p2997_p12), %v5216_v18, %v2508_v1 }
 0x396   : > { %2478 = vst [vmem:[#allocation2 + $0xc8] sm:$0xff] %v2446_v26  ;;  %v2448_v60 = vadd.f32 %v2408_v8, %v1878_v47  ;;  %v2509_v47 = vld [vmem:[#allocation2 + $0xa0] sm:$0xff] (!%p2997_p12)  ;;  %v2510_v26 = vld [vmem:[#allocation2 + $0xa8] sm:$0xff] (!%p2997_p12)  ;;  %v2511_v9 = vld [vmem:[#allocation2 + $0xb0] sm:$0xff] (!%p2997_p12) }
 0x397   : > { %2479 = vst [vmem:[#allocation2 + $0xd0] sm:$0xff] %v2447_v62  ;;  %v2553_v62 = vadd.f32 (!%p2997_p12), %v5212_v15, %v2509_v47  ;;  %v2554_v8 = vadd.f32 (!%p2997_p12), %v5216_v18, %v2510_v26  ;;  %2581 = vst [vmem:[%s4348_s25 + $0x80] sm:$0xff] (!%p2997_p12), %v2549_v20 }
 0x398   : > { %2480 = vst [vmem:[#allocation2 + $0xd8] sm:$0xff] %v2448_v60  ;;  %v2555_v60 = vadd.f32 (!%p2997_p12), %v5212_v15, %v2511_v9  ;;  %2582 = vst [vmem:[%s4348_s25 + $0x88] sm:$0xff] (!%p2997_p12), %v2550_v49 }
 0x399   : > { %2583 = vst [vmem:[%s4348_s25 + $0x90] sm:$0xff] (!%p2997_p12), %v2551_v30  ;;  %2584 = vst [vmem:[%s4348_s25 + $0x98] sm:$0xff] (!%p2997_p12), %v2552_v7 }
 0x39a   : > { %v2412_v17 = vpop.f32.mrb[44].mxu1  ;;  %2488 = sbr.rel (%p2997_p12) target bundleno = 939 (0x3ab), region = 68  ;;  %2585 = vst [vmem:[%s4348_s25 + $0xa0] sm:$0xff] (!%p2997_p12), %v2553_v62  ;;  %2586 = vst [vmem:[%s4348_s25 + $0xa8] sm:$0xff] (!%p2997_p12), %v2554_v8 }
 0x39b   : > { %v2449_v45 = vadd.f32 %v2412_v17, %v1879_v41  ;;  %v2414_v36 = vpop.f32.mrb[45].mxu1  ;;  %v2512_v41 = vld [vmem:[#allocation2 + $0xb8] sm:$0xff] (!%p2997_p12)  ;;  %2587 = vst [vmem:[%s4348_s25 + $0xb0] sm:$0xff] (!%p2997_p12), %v2555_v60 }
 0x39c   : > { %v2450_v11 = vadd.f32 %v2414_v36, %v1880_v48  ;;  %v2416_v51 = vpop.f32.mrb[46].mxu1  ;;  %v2513_v48 = vld [vmem:[#allocation2 + $0xc0] sm:$0xff] (!%p2997_p12) }
 0x39d   : > { %2481 = vst [vmem:[#allocation2 + $0xe0] sm:$0xff] %v2449_v45  ;;  %v2451_v35 = vadd.f32 %v2416_v51, %v1881_v57  ;;  %v2418_v2 = vpop.f32.mrb[47].mxu1  ;;  %v2514_v17 = vld [vmem:[#allocation2 + $0xc8] sm:$0xff] (!%p2997_p12)  ;;  %v2556_v57 = vadd.f32 (!%p2997_p12), %v5216_v18, %v2512_v41  ;;  %v2557_v45 = vadd.f32 (!%p2997_p12), %v5212_v15, %v2513_v48 }
 0x39e   : > { %2482 = vst [vmem:[#allocation2 + $0xe8] sm:$0xff] %v2450_v11  ;;  %v2452_v29 = vadd.f32 %v2418_v2, %v1882_v55  ;;  %v2558_v36 = vadd.f32 (!%p2997_p12), %v5216_v18, %v2514_v17  ;;  %v2515_v55 = vld [vmem:[#allocation2 + $0xd0] sm:$0xff] (!%p2997_p12) }
 0x39f   : > { %2483 = vst [vmem:[#allocation2 + $0xf0] sm:$0xff] %v2451_v35  ;;  %v2516_v11 = vld [vmem:[#allocation2 + $0xd8] sm:$0xff] (!%p2997_p12)  ;;  %v2559_v35 = vadd.f32 (!%p2997_p12), %v5212_v15, %v2515_v55  ;;  %2588 = vst [vmem:[%s4348_s25 + $0xb8] sm:$0xff] (!%p2997_p12), %v2556_v57 }
 0x3a0   : > { %2484 = vst [vmem:[#allocation2 + $0xf8] sm:$0xff] %v2452_v29  ;;  %v2560_v2 = vadd.f32 (!%p2997_p12), %v5216_v18, %v2516_v11  ;;  %2589 = vst [vmem:[%s4348_s25 + $0xc0] sm:$0xff] (!%p2997_p12), %v2557_v45 }
 0x3a1   : > { %2590 = vst [vmem:[%s4348_s25 + $0xc8] sm:$0xff] %v2558_v36  ;;  %2591 = vst [vmem:[%s4348_s25 + $0xd0] sm:$0xff] %v2559_v35 }
 0x3a2   : > { %2592 = vst [vmem:[%s4348_s25 + $0xd8] sm:$0xff] %v2560_v2 }
 0x3a4   : > { %v2517_v51 = vld [vmem:[#allocation2 + $0xe0] sm:$0xff] }
 0x3a5   : > { %v2561_v29 = vadd.f32 %v5212_v15, %v2517_v51  ;;  %v2518_v53 = vld [vmem:[#allocation2 + $0xe8] sm:$0xff] }
 0x3a6   : > { %v2519_v19 = vld [vmem:[#allocation2 + $0xf0] sm:$0xff]  ;;  %v2562_v16 = vadd.f32 %v5216_v18, %v2518_v53 }
 0x3a7   : > { %v2520_v34 = vld [vmem:[#allocation2 + $0xf8] sm:$0xff]  ;;  %v2563_v37 = vadd.f32 %v5212_v15, %v2519_v19  ;;  %2593 = vst [vmem:[%s4348_s25 + $0xe0] sm:$0xff] %v2561_v29 }
 0x3a8   : > { %v2564_v40 = vadd.f32 %v5216_v18, %v2520_v34  ;;  %2594 = vst [vmem:[%s4348_s25 + $0xe8] sm:$0xff] %v2562_v16 }
 0x3a9   : > { %2595 = vst [vmem:[%s4348_s25 + $0xf0] sm:$0xff] %v2563_v37 }
 0x3aa   : > { %2596 = vst [vmem:[%s4348_s25 + $0xf8] sm:$0xff] %v2564_v40 }
 0x3ab PF: > { %s5496_s16 = sld [smem:[#allocation20_spill]]  ;;  %s5497_s4 = sld [smem:[#allocation23_spill]] }
 0x3ac   : > { %s5498_s7 = sld [smem:[#allocation53_spill]]  ;;  %s2612_s15 = sshll.u32 %s4348_s25, 4  ;;  %s5289_s15 = int_to_ptr.vmem [resolvable:$true] %s2612_s15 }
 0x3ad   : > { %s2598_s24 = scalar_lea.sflag [#allocation5], %s4317_s6  ;;  %s3799_s18 = scalar_lea.vmem %s5289_s15, 4096 }
 0x3ae   : > { %p3800_p13 = scmp.ne.s32.totalorder %s5289_s15, %s3799_s18  ;;  %s3946_s21 = smov [#allocation12]  }
 0x3af   : > { %s3803_s30 = sshll.u32 %s3946_s21, 4  ;;  %s3804_s30 = int_to_ptr.vmem [resolvable:$false] %s3803_s30 }
 0x3b0   : > { %s3805_s9 = scalar_lea.vmem %s3804_s30, 8192  ;;  %p3806_p6 = scmp.lt.s32.totalorder %s5289_s15, %s3804_s30 }
 0x3b1   : > { %s3009_s0 = sshll.u32 %s5496_s16, 12  ;;  %p5499_p9 = scmp.ne.s32.totalorder %s5497_s4, 0 }
 0x3b2   : > { %s5286_s13 = scalar_lea.hbm %s5498_s7, %s3009_s0  ;;  %p3807_p8 = scmp.lt.s32.totalorder %s3805_s9, %s3799_s18 }
 0x3b3   : > { %p3801_p4 = pnand %p3800_p13, %p5499_p9 }
 0x3b4   : > { %p3808_p5 = por %p3807_p8, %p3806_p6 }
 0x3b5   : > { %p3802_p0 = pneg %p3801_p4 }
 0x3b7   : > { %p3809_p2 = pnand %p3808_p5, %p3802_p0 }
 0x3b9   : > { %3812 = shalt.err (!%p3809_p2)
}
 0x3ba   : > { %s3813_s12 = scalar_lea.hbm %s5286_s13, 4096  ;;  %s3817_s5 = scalar_lea.hbm %s5498_s7, 8192 }
 0x3bb   : > { %p3814_p3 = scmp.ne.s32.totalorder %s5286_s13, %s3813_s12  ;;  %p3818_p1 = scmp.lt.u32.totalorder %s5286_s13, %s5498_s7 }
 0x3bc   : > { %p3819_p10 = scmp.lt.u32.totalorder %s3817_s5, %s3813_s12  ;;  %p3821_p13 = scmp.lt.u32.totalorder %s3813_s12, %s5286_s13 }
 0x3bd   : > { %p3815_p7 = pnand %p3814_p3, %p5499_p9 }
 0x3be   : > { %p3820_p12 = por %p3819_p10, %p3818_p1 }
 0x3bf   : > { %p3816_p11 = pneg %p3815_p7 }
 0x3c0   : > { %p3822_p4 = por %p3821_p13, %p3820_p12 }
 0x3c2   : > { %p3823_p0 = pnand %p3822_p4, %p3816_p11 }
 0x3c4   : > { %3826 = shalt.err (!%p3823_p0)
}
 0x3c5   : > { %s3947_s29 = smov 256   ;;  %s3948_s16 = smov 16  }
 0x3c6   : > { %3095 = dma.vmem_to_hbm [thread:$0]  (%p5499_p9), %s5289_s15, 4096, %s5286_s13, %s2598_s24, %s3947_s29, %s3947_s29, %s3948_s16  }
 0x3c7 PF: > { %s5500_s0 = sld [smem:[#allocation18_spill]]  ;;  %s5501_s17 = sld [smem:[#allocation24_spill]] }
 0x3c8   : > { %p3121_p6 = scmp.ge.s32.totalorder %s3933_s28, 2 }
 0x3cd   : > { %s2627_s27 = sand.u32 1, %s5500_s0   ;;  %p5502_p8 = scmp.ne.s32.totalorder %s5501_s17, 0 }
 0x3ce   : > { %s2628_s18 = scalar_lea.sflag [#allocation5], %s2627_s27 }
 0x3cf   : > { %p3115_p5 = pnand %p3121_p6, %p5502_p8 }
 0x3d1   : > { %3888 = dma.done.wait (!%p3115_p5), %s2628_s18, 4096  }
 0x3d2   : > { %3890 = vsyncadd (!%p3115_p5), %s2628_s18, 4294963200  ;;  %s27_s28 = sadd.s32 1, %s3933_s28   ;;  %s5503_s25 = sld [smem:[#allocation21_spill]] }
 0x3d3   : > { %p24_p2 = scmp.ge.s32.totalorder %s27_s28, 6   ;;  %s5504_s6 = sld [smem:[#allocation25_spill]] }
 0x3d4   : > { %s5505_s27 = sld [smem:[#allocation26_spill]]  ;;  %s5506_s18 = smov %s3897_s19 }
 0x3d5   : > { %s5507_s19 = smov %s3901_s20  ;;  %s5508_s20 = smov %s4194_s14 }
 0x3d6   : > { %s5509_s21 = smov %s3909_s22  ;;  %s5510_s22 = smov %s3913_s23 }
 0x3d7   : > { %s5511_s23 = smov %s4214_s1  ;;  %s5512_s24 = smov %s3925_s26 }
 0x3d8   :  { %26 = sbr.rel (!%p24_p2) target bundleno = 18 (0x12), region = 134 }
 0x3d9   : > { %s5513_s26 = smov %s5504_s6 }
 0x3df   :  { %2633 = vsyncpa [#allocation4], 1 }
 0x3e0   :  { %2635 = vsyncpa [#allocation4 + $0x1], 1 }
 0x3e1   :  { %2636 = vsyncpa [#allocation7], 1 }
 0x3e2   :  { %2638 = vsyncpa [#allocation7 + $0x1], 1 }
 0x3e3   :  { %2639 = vsyncpa [#allocation10], 1 }
 0x3e4   :  { %2641 = vsyncpa [#allocation10 + $0x1], 1 }
 0x3e5   :  { %2642 = vsyncpa [#allocation5], 1 }
 0x3e6   :  { %2644 = vsyncpa [#allocation5 + $0x1], 1 }

</bundles_post_ra>
